<compile_context>
chip_gen: v7x
topology: tpu7x:2x2x1
jax: 0.10.0
libtpu: 0.0.40
codegen_flags: <defaults>
</compile_context>

<pallas_src>
import functools

import jax
import jax.numpy as jnp
import numpy as np
from jax import lax
from jax.experimental import pallas as pl
from jax.experimental.pallas import tpu as pltpu


def _cdiv(a, b):
    return -(-a // b)


def _round_up(a, b):
    return _cdiv(a, b) * b


def _corr_kernel(one_ref, two_ref, out_ref, *, inv_c):
    # one_ref: (1, tH, C, Wo_p)         first image rows of this tile, [y, c, x]
    # two_ref: (1, 1, tH + 6, C, Wt_p)  padded second-image band (6 halo rows)
    # out_ref: (1, 49, tH, Wo_p)
    tH = one_ref.shape[1]
    Wo_p = one_ref.shape[-1]
    Wt_p = two_ref.shape[-1]
    out_dtype = out_ref.dtype

    def row_body(y, carry):
        # `one` row is loaded ONCE per output row and reused across all 49 taps
        # (the 1/C scale is folded in here, once per row).
        one_row = one_ref[0, y].astype(jnp.float32) * inv_c            # (C, Wo_p)
        for ky in range(7):
            # One load of the `two` row per (y, ky); the 7 kx displacements are
            # derived in-register below (XLU roll), no VMEM scratch round-trip.
            two_row = two_ref[0, 0, y + ky].astype(jnp.float32)        # (C, Wt_p)
            for kx in range(7):
                if kx == 0:
                    shifted = two_row[:, :Wo_p]
                else:
                    # lane i of `shifted` = lane (i + kx) of `two_row`
                    shifted = pltpu.roll(two_row, shift=Wt_p - kx, axis=1)[:, :Wo_p]
                corr = jnp.sum(one_row * shifted, axis=0, keepdims=True)  # (1, Wo_p)
                out_ref[0, ky * 7 + kx, pl.ds(y, 1), :] = corr.astype(out_dtype)
        return carry

    lax.fori_loop(0, tH, row_body, 0)


def _vmem_params():
    """Generation-aware VMEM budgets: (working-set budget, vmem_limit, is_v7x).
    v4/v5e/v6e have 128 MiB of VMEM per core; v7x has 64 MiB per TensorCore."""
    try:
        kind = jax.devices()[0].device_kind.lower()
    except Exception:  # pragma: no cover - defensive
        kind = ""
    is_v7 = ("v7" in kind) or ("7x" in kind)
    if is_v7:
        return 28 << 20, 48 << 20, True
    return 72 << 20, 104 << 20, False


def _pick_row_tile(Ho, need, budget, min_tiles):
    """Pick (rows per tile, number of row tiles).  A single tile covering all
    rows is preferred (no halo duplication / row padding; tH then need not be
    a multiple of 8).  Otherwise tH is a multiple of 8 (output-block tiling
    rule) and tiles are made as large as the VMEM budget allows while keeping
    the requested minimum number of tiles (v7x megacore)."""
    if min_tiles <= 1 and need(Ho) <= budget:
        return Ho, 1
    n_t = max(2, min_tiles)
    while True:
        tH = max(8, _round_up(_cdiv(Ho, n_t), 8))
        if need(tH) <= budget or tH == 8:
            # NOTE: if even tH == 8 misses the budget (huge C * W), we still
            # proceed; vmem_limit_bytes gives the compiler extra headroom.
            return tH, _cdiv(Ho, tH)
        n_t += 1


def correlation_pallas(ten_one, ten_two, int_stride):
    """ModuleCorrelation.forward(tenOne, tenTwo, intStride). Inputs NCHW."""
    assert ten_one.shape == ten_two.shape
    B, C, H, W = ten_one.shape
    s = int(int_stride)
    Ho = _cdiv(H, s)
    Wo = _cdiv(W, s)
    dtype = ten_one.dtype
    itemsize = jnp.dtype(dtype).itemsize

    # Lane padding: `one`/output lane extent and the `two` lane extent (which
    # carries the +6 tap halo) are padded to multiples of 128.
    Wo_p = _round_up(Wo, 128)
    Wt_p = _round_up(Wo + 6, 128)

    # ---- glue (plain JAX): stride subsample, zero-pad, relayout to [y, c, x] ----
    # Every correlation tap lands on a multiple of s, so subsample once up front.
    one_k = jnp.transpose(ten_one[:, :, ::s, ::s], (0, 2, 1, 3))        # (B, Ho, C, Wo)
    two_pad = jnp.pad(ten_two, ((0, 0), (0, 0), (3 * s, 3 * s), (3 * s, 3 * s)))
    two_k = jnp.transpose(two_pad[:, :, ::s, ::s], (0, 2, 1, 3))        # (B, Ho+6, C, Wo+6)
    one_k = jnp.pad(one_k, ((0, 0), (0, 0), (0, 0), (0, Wo_p - Wo)))
    two_k = jnp.pad(two_k, ((0, 0), (0, 0), (0, 0), (0, Wt_p - (Wo + 6))))

    # ---- row tiling (6-row halo), sized to a generation-aware VMEM budget ----
    budget, vmem_limit, is_v7 = _vmem_params()

    def need(t):   # double-buffered in/out blocks for one grid step
        return 2 * itemsize * (t * C * Wo_p + (t + 6) * C * Wt_p + 49 * t * Wo_p)

    min_tiles = 2 if (is_v7 and B == 1) else 1      # keep both v7x TCs busy
    tH, n_t = _pick_row_tile(Ho, need, budget, min_tiles)
    Ho_pad = n_t * tH
    if Ho_pad > Ho:
        one_k = jnp.pad(one_k, ((0, 0), (0, Ho_pad - Ho), (0, 0), (0, 0)))
        two_k = jnp.pad(two_k, ((0, 0), (0, Ho_pad - Ho), (0, 0), (0, 0)))

    if n_t == 1:
        # Single row tile: no banding / duplication needed at all.
        two_bands = two_k[:, None]                                      # (B, 1, tH+6, C, Wt_p)
    else:
        # Pre-banded overlapping windows (duplicates only the 6 halo rows per
        # band) so plain Blocked BlockSpecs express them and get auto-pipelined.
        two_bands = jnp.stack(
            [two_k[:, t * tH: t * tH + tH + 6] for t in range(n_t)], axis=1)

    kernel = functools.partial(_corr_kernel, inv_c=1.0 / C)
    out = pl.pallas_call(
        kernel,
        out_shape=jax.ShapeDtypeStruct((B, 49, Ho_pad, Wo_p), dtype),
        grid_spec=pltpu.PrefetchScalarGridSpec(
            num_scalar_prefetch=0,
            grid=(B, n_t),
            in_specs=[
                pl.BlockSpec((1, tH, C, Wo_p), lambda b, t: (b, t, 0, 0)),
                pl.BlockSpec((1, 1, tH + 6, C, Wt_p),
                             lambda b, t: (b, t, 0, 0, 0)),
            ],
            out_specs=pl.BlockSpec((1, 49, tH, Wo_p), lambda b, t: (b, 0, t, 0)),
        ),
        compiler_params=pltpu.CompilerParams(
            dimension_semantics=("parallel", "parallel"),
            vmem_limit_bytes=vmem_limit),
    )(one_k, two_bands)
    return out[:, :, :Ho, :Wo]


def correlation_ref(ten_one, ten_two, int_stride):
    """Pure-JAX reference with identical semantics (for validation)."""
    B, C, H, W = ten_one.shape
    s = int(int_stride)
    Ho, Wo = _cdiv(H, s), _cdiv(W, s)
    two_pad = jnp.pad(ten_two, ((0, 0), (0, 0), (3 * s, 3 * s), (3 * s, 3 * s)))
    a = ten_one[:, :, ::s, ::s]                                         # (B,C,Ho,Wo)
    chans = []
    for ky in range(7):
        for kx in range(7):
            b = two_pad[:, :,
                        ky * s: ky * s + (Ho - 1) * s + 1: s,
                        kx * s: kx * s + (Wo - 1) * s + 1: s]           # (B,C,Ho,Wo)
            chans.append(jnp.mean(a.astype(jnp.float32) * b.astype(jnp.float32), axis=1))
    return jnp.stack(chans, axis=1).astype(ten_one.dtype)               # (B,49,Ho,Wo)


if __name__ == "__main__":
    key = jax.random.PRNGKey(0)
    k1, k2 = jax.random.split(key)

    cases = [
        ((2, 32, 16, 16), 1),
        ((2, 32, 16, 16), 2),
        ((1, 24, 20, 20), 2),   # Ho not covered by a single 8-row tile on v7x
    ]
    for shape, stride in cases:
        B, C, H, W = shape
        ten_one = jax.random.normal(k1, shape, dtype=jnp.float32)
        ten_two = jax.random.normal(k2, shape, dtype=jnp.float32)
        out = jax.block_until_ready(correlation_pallas(ten_one, ten_two, stride))
        ref = jax.block_until_ready(correlation_ref(ten_one, ten_two, stride))
        assert out.shape == (B, 49, _cdiv(H, stride), _cdiv(W, stride)), out.shape
        np.testing.assert_allclose(np.asarray(out), np.asarray(ref),
                                   rtol=1e-5, atol=1e-5)

    # TODO(synk): backward pass (kernel_Correlation_updateGradOne/Two) not
    # implemented; only the forward correlation is required here.
    print("KERNEL_OK")
</pallas_src>

<mosaic_0001>
module attributes {stable_mosaic.version = 11 : i64} {
  func.func @_corr_kernel(%arg0: i32, %arg1: i32, %arg2: memref<1x16x32x128xf32, #tpu.memory_space<vmem>>, %arg3: memref<1x1x22x32x128xf32, #tpu.memory_space<vmem>>, %arg4: memref<1x49x16x128xf32, #tpu.memory_space<vmem>>) attributes {dimension_semantics = [#tpu.dimension_semantics<parallel>, #tpu.dimension_semantics<parallel>], iteration_bounds = array<i64: 2, 1>, scalar_prefetch = 0 : i64, scratch_operands = 0 : i64, tpu.core_type = #tpu.core_type<tc>, window_params = [{transform_indices = @transform_0, window_bounds = array<i64: 1, 16, 32, 128>}, {transform_indices = @transform_1, window_bounds = array<i64: 1, 1, 22, 32, 128>}, {transform_indices = @transform_2, window_bounds = array<i64: 1, 49, 16, 128>}]} {
    %c0_i32 = arith.constant 0 : i32
    %c16_i32 = arith.constant 16 : i32
    %0 = arith.addi %c0_i32, %c16_i32 : i32
    %c1_i32 = arith.constant 1 : i32
    scf.for %arg5 = %c0_i32 to %0 step %c1_i32  : i32 {
      %c0 = arith.constant 0 : index
      %1 = arith.index_cast %arg5 : i32 to index
      %c0_1 = arith.constant 0 : index
      %c0_2 = arith.constant 0 : index
      %2 = vector.load %arg2[%c0, %1, %c0_1, %c0_2] : memref<1x16x32x128xf32, #tpu.memory_space<vmem>>, vector<1x1x32x128xf32>
      %3 = vector.shape_cast %2 : vector<1x1x32x128xf32> to vector<32x128xf32>
      %cst = arith.constant 3.125000e-02 : f32
      %4 = vector.broadcast %cst : f32 to vector<32x128xf32>
      %5 = arith.mulf %3, %4 : vector<32x128xf32>
      %c0_i32_3 = arith.constant 0 : i32
      %6 = arith.addi %arg5, %c0_i32_3 : i32
      %c0_4 = arith.constant 0 : index
      %c0_5 = arith.constant 0 : index
      %7 = arith.index_cast %6 : i32 to index
      %c0_6 = arith.constant 0 : index
      %c0_7 = arith.constant 0 : index
      %8 = vector.load %arg3[%c0_4, %c0_5, %7, %c0_6, %c0_7] : memref<1x1x22x32x128xf32, #tpu.memory_space<vmem>>, vector<1x1x1x32x128xf32>
      %9 = vector.shape_cast %8 : vector<1x1x1x32x128xf32> to vector<32x128xf32>
      %10 = arith.mulf %5, %9 : vector<32x128xf32>
      %cst_8 = arith.constant dense<0.000000e+00> : vector<128xf32>
      %11 = vector.multi_reduction <add>, %10, %cst_8 [0] : vector<32x128xf32> to vector<128xf32>
      %12 = vector.shape_cast %11 : vector<128xf32> to vector<1x128xf32>
      %c0_9 = arith.constant 0 : index
      %c0_10 = arith.constant 0 : index
      %13 = arith.index_cast %arg5 : i32 to index
      %c0_11 = arith.constant 0 : index
      %14 = vector.load %arg4[%c0_9, %c0_10, %13, %c0_11] : memref<1x49x16x128xf32, #tpu.memory_space<vmem>>, vector<1x1x1x128xf32>
      %15 = vector.shape_cast %14 : vector<1x1x1x128xf32> to vector<1x128xf32>
      %16 = vector.shape_cast %12 : vector<1x128xf32> to vector<1x1x1x128xf32>
      tpu.vector_store %arg4[%c0_9, %c0_10, %13, %c0_11], %16 {strides = array<i32>} : memref<1x49x16x128xf32, #tpu.memory_space<vmem>>, vector<1x1x1x128xf32>,
      %c127_i32 = arith.constant 127 : i32
      %17 = tpu.dynamic_rotate %9 by %c127_i32 dim 1 : vector<32x128xf32>, i32 -> vector<32x128xf32>
      %18 = arith.mulf %5, %17 : vector<32x128xf32>
      %cst_12 = arith.constant dense<0.000000e+00> : vector<128xf32>
      %19 = vector.multi_reduction <add>, %18, %cst_12 [0] : vector<32x128xf32> to vector<128xf32>
      %20 = vector.shape_cast %19 : vector<128xf32> to vector<1x128xf32>
      %c0_13 = arith.constant 0 : index
      %c1 = arith.constant 1 : index
      %21 = arith.index_cast %arg5 : i32 to index
      %c0_14 = arith.constant 0 : index
      %22 = vector.load %arg4[%c0_13, %c1, %21, %c0_14] : memref<1x49x16x128xf32, #tpu.memory_space<vmem>>, vector<1x1x1x128xf32>
      %23 = vector.shape_cast %22 : vector<1x1x1x128xf32> to vector<1x128xf32>
      %24 = vector.shape_cast %20 : vector<1x128xf32> to vector<1x1x1x128xf32>
      tpu.vector_store %arg4[%c0_13, %c1, %21, %c0_14], %24 {strides = array<i32>} : memref<1x49x16x128xf32, #tpu.memory_space<vmem>>, vector<1x1x1x128xf32>,
      %c126_i32 = arith.constant 126 : i32
      %25 = tpu.dynamic_rotate %9 by %c126_i32 dim 1 : vector<32x128xf32>, i32 -> vector<32x128xf32>
      %26 = arith.mulf %5, %25 : vector<32x128xf32>
      %cst_15 = arith.constant dense<0.000000e+00> : vector<128xf32>
      %27 = vector.multi_reduction <add>, %26, %cst_15 [0] : vector<32x128xf32> to vector<128xf32>
      %28 = vector.shape_cast %27 : vector<128xf32> to vector<1x128xf32>
      %c0_16 = arith.constant 0 : index
      %c2 = arith.constant 2 : index
      %29 = arith.index_cast %arg5 : i32 to index
      %c0_17 = arith.constant 0 : index
      %30 = vector.load %arg4[%c0_16, %c2, %29, %c0_17] : memref<1x49x16x128xf32, #tpu.memory_space<vmem>>, vector<1x1x1x128xf32>
      %31 = vector.shape_cast %30 : vector<1x1x1x128xf32> to vector<1x128xf32>
      %32 = vector.shape_cast %28 : vector<1x128xf32> to vector<1x1x1x128xf32>
      tpu.vector_store %arg4[%c0_16, %c2, %29, %c0_17], %32 {strides = array<i32>} : memref<1x49x16x128xf32, #tpu.memory_space<vmem>>, vector<1x1x1x128xf32>,
      %c125_i32 = arith.constant 125 : i32
      %33 = tpu.dynamic_rotate %9 by %c125_i32 dim 1 : vector<32x128xf32>, i32 -> vector<32x128xf32>
      %34 = arith.mulf %5, %33 : vector<32x128xf32>
      %cst_18 = arith.constant dense<0.000000e+00> : vector<128xf32>
      %35 = vector.multi_reduction <add>, %34, %cst_18 [0] : vector<32x128xf32> to vector<128xf32>
      %36 = vector.shape_cast %35 : vector<128xf32> to vector<1x128xf32>
      %c0_19 = arith.constant 0 : index
      %c3 = arith.constant 3 : index
      %37 = arith.index_cast %arg5 : i32 to index
      %c0_20 = arith.constant 0 : index
      %38 = vector.load %arg4[%c0_19, %c3, %37, %c0_20] : memref<1x49x16x128xf32, #tpu.memory_space<vmem>>, vector<1x1x1x128xf32>
      %39 = vector.shape_cast %38 : vector<1x1x1x128xf32> to vector<1x128xf32>
      %40 = vector.shape_cast %36 : vector<1x128xf32> to vector<1x1x1x128xf32>
      tpu.vector_store %arg4[%c0_19, %c3, %37, %c0_20], %40 {strides = array<i32>} : memref<1x49x16x128xf32, #tpu.memory_space<vmem>>, vector<1x1x1x128xf32>,
      %c124_i32 = arith.constant 124 : i32
      %41 = tpu.dynamic_rotate %9 by %c124_i32 dim 1 : vector<32x128xf32>, i32 -> vector<32x128xf32>
      %42 = arith.mulf %5, %41 : vector<32x128xf32>
      %cst_21 = arith.constant dense<0.000000e+00> : vector<128xf32>
      %43 = vector.multi_reduction <add>, %42, %cst_21 [0] : vector<32x128xf32> to vector<128xf32>
      %44 = vector.shape_cast %43 : vector<128xf32> to vector<1x128xf32>
      %c0_22 = arith.constant 0 : index
      %c4 = arith.constant 4 : index
      %45 = arith.index_cast %arg5 : i32 to index
      %c0_23 = arith.constant 0 : index
      %46 = vector.load %arg4[%c0_22, %c4, %45, %c0_23] : memref<1x49x16x128xf32, #tpu.memory_space<vmem>>, vector<1x1x1x128xf32>
      %47 = vector.shape_cast %46 : vector<1x1x1x128xf32> to vector<1x128xf32>
      %48 = vector.shape_cast %44 : vector<1x128xf32> to vector<1x1x1x128xf32>
      tpu.vector_store %arg4[%c0_22, %c4, %45, %c0_23], %48 {strides = array<i32>} : memref<1x49x16x128xf32, #tpu.memory_space<vmem>>, vector<1x1x1x128xf32>,
      %c123_i32 = arith.constant 123 : i32
      %49 = tpu.dynamic_rotate %9 by %c123_i32 dim 1 : vector<32x128xf32>, i32 -> vector<32x128xf32>
      %50 = arith.mulf %5, %49 : vector<32x128xf32>
      %cst_24 = arith.constant dense<0.000000e+00> : vector<128xf32>
      %51 = vector.multi_reduction <add>, %50, %cst_24 [0] : vector<32x128xf32> to vector<128xf32>
      %52 = vector.shape_cast %51 : vector<128xf32> to vector<1x128xf32>
      %c0_25 = arith.constant 0 : index
      %c5 = arith.constant 5 : index
      %53 = arith.index_cast %arg5 : i32 to index
      %c0_26 = arith.constant 0 : index
      %54 = vector.load %arg4[%c0_25, %c5, %53, %c0_26] : memref<1x49x16x128xf32, #tpu.memory_space<vmem>>, vector<1x1x1x128xf32>
      %55 = vector.shape_cast %54 : vector<1x1x1x128xf32> to vector<1x128xf32>
      %56 = vector.shape_cast %52 : vector<1x128xf32> to vector<1x1x1x128xf32>
      tpu.vector_store %arg4[%c0_25, %c5, %53, %c0_26], %56 {strides = array<i32>} : memref<1x49x16x128xf32, #tpu.memory_space<vmem>>, vector<1x1x1x128xf32>,
      %c122_i32 = arith.constant 122 : i32
      %57 = tpu.dynamic_rotate %9 by %c122_i32 dim 1 : vector<32x128xf32>, i32 -> vector<32x128xf32>
      %58 = arith.mulf %5, %57 : vector<32x128xf32>
      %cst_27 = arith.constant dense<0.000000e+00> : vector<128xf32>
      %59 = vector.multi_reduction <add>, %58, %cst_27 [0] : vector<32x128xf32> to vector<128xf32>
      %60 = vector.shape_cast %59 : vector<128xf32> to vector<1x128xf32>
      %c0_28 = arith.constant 0 : index
      %c6 = arith.constant 6 : index
      %61 = arith.index_cast %arg5 : i32 to index
      %c0_29 = arith.constant 0 : index
      %62 = vector.load %arg4[%c0_28, %c6, %61, %c0_29] : memref<1x49x16x128xf32, #tpu.memory_space<vmem>>, vector<1x1x1x128xf32>
      %63 = vector.shape_cast %62 : vector<1x1x1x128xf32> to vector<1x128xf32>
      %64 = vector.shape_cast %60 : vector<1x128xf32> to vector<1x1x1x128xf32>
      tpu.vector_store %arg4[%c0_28, %c6, %61, %c0_29], %64 {strides = array<i32>} : memref<1x49x16x128xf32, #tpu.memory_space<vmem>>, vector<1x1x1x128xf32>,
      %c1_i32_30 = arith.constant 1 : i32
      %65 = arith.addi %arg5, %c1_i32_30 : i32
      %c0_31 = arith.constant 0 : index
      %c0_32 = arith.constant 0 : index
      %66 = arith.index_cast %65 : i32 to index
      %c0_33 = arith.constant 0 : index
      %c0_34 = arith.constant 0 : index
      %67 = vector.load %arg3[%c0_31, %c0_32, %66, %c0_33, %c0_34] : memref<1x1x22x32x128xf32, #tpu.memory_space<vmem>>, vector<1x1x1x32x128xf32>
      %68 = vector.shape_cast %67 : vector<1x1x1x32x128xf32> to vector<32x128xf32>
      %69 = arith.mulf %5, %68 : vector<32x128xf32>
      %cst_35 = arith.constant dense<0.000000e+00> : vector<128xf32>
      %70 = vector.multi_reduction <add>, %69, %cst_35 [0] : vector<32x128xf32> to vector<128xf32>
      %71 = vector.shape_cast %70 : vector<128xf32> to vector<1x128xf32>
      %c0_36 = arith.constant 0 : index
      %c7 = arith.constant 7 : index
      %72 = arith.index_cast %arg5 : i32 to index
      %c0_37 = arith.constant 0 : index
      %73 = vector.load %arg4[%c0_36, %c7, %72, %c0_37] : memref<1x49x16x128xf32, #tpu.memory_space<vmem>>, vector<1x1x1x128xf32>
      %74 = vector.shape_cast %73 : vector<1x1x1x128xf32> to vector<1x128xf32>
      %75 = vector.shape_cast %71 : vector<1x128xf32> to vector<1x1x1x128xf32>
      tpu.vector_store %arg4[%c0_36, %c7, %72, %c0_37], %75 {strides = array<i32>} : memref<1x49x16x128xf32, #tpu.memory_space<vmem>>, vector<1x1x1x128xf32>,
      %c127_i32_38 = arith.constant 127 : i32
      %76 = tpu.dynamic_rotate %68 by %c127_i32_38 dim 1 : vector<32x128xf32>, i32 -> vector<32x128xf32>
      %77 = arith.mulf %5, %76 : vector<32x128xf32>
      %cst_39 = arith.constant dense<0.000000e+00> : vector<128xf32>
      %78 = vector.multi_reduction <add>, %77, %cst_39 [0] : vector<32x128xf32> to vector<128xf32>
      %79 = vector.shape_cast %78 : vector<128xf32> to vector<1x128xf32>
      %c0_40 = arith.constant 0 : index
      %c8 = arith.constant 8 : index
      %80 = arith.index_cast %arg5 : i32 to index
      %c0_41 = arith.constant 0 : index
      %81 = vector.load %arg4[%c0_40, %c8, %80, %c0_41] : memref<1x49x16x128xf32, #tpu.memory_space<vmem>>, vector<1x1x1x128xf32>
      %82 = vector.shape_cast %81 : vector<1x1x1x128xf32> to vector<1x128xf32>
      %83 = vector.shape_cast %79 : vector<1x128xf32> to vector<1x1x1x128xf32>
      tpu.vector_store %arg4[%c0_40, %c8, %80, %c0_41], %83 {strides = array<i32>} : memref<1x49x16x128xf32, #tpu.memory_space<vmem>>, vector<1x1x1x128xf32>,
      %c126_i32_42 = arith.constant 126 : i32
      %84 = tpu.dynamic_rotate %68 by %c126_i32_42 dim 1 : vector<32x128xf32>, i32 -> vector<32x128xf32>
      %85 = arith.mulf %5, %84 : vector<32x128xf32>
      %cst_43 = arith.constant dense<0.000000e+00> : vector<128xf32>
      %86 = vector.multi_reduction <add>, %85, %cst_43 [0] : vector<32x128xf32> to vector<128xf32>
      %87 = vector.shape_cast %86 : vector<128xf32> to vector<1x128xf32>
      %c0_44 = arith.constant 0 : index
      %c9 = arith.constant 9 : index
      %88 = arith.index_cast %arg5 : i32 to index
      %c0_45 = arith.constant 0 : index
      %89 = vector.load %arg4[%c0_44, %c9, %88, %c0_45] : memref<1x49x16x128xf32, #tpu.memory_space<vmem>>, vector<1x1x1x128xf32>
      %90 = vector.shape_cast %89 : vector<1x1x1x128xf32> to vector<1x128xf32>
      %91 = vector.shape_cast %87 : vector<1x128xf32> to vector<1x1x1x128xf32>
      tpu.vector_store %arg4[%c0_44, %c9, %88, %c0_45], %91 {strides = array<i32>} : memref<1x49x16x128xf32, #tpu.memory_space<vmem>>, vector<1x1x1x128xf32>,
      %c125_i32_46 = arith.constant 125 : i32
      %92 = tpu.dynamic_rotate %68 by %c125_i32_46 dim 1 : vector<32x128xf32>, i32 -> vector<32x128xf32>
      %93 = arith.mulf %5, %92 : vector<32x128xf32>
      %cst_47 = arith.constant dense<0.000000e+00> : vector<128xf32>
      %94 = vector.multi_reduction <add>, %93, %cst_47 [0] : vector<32x128xf32> to vector<128xf32>
      %95 = vector.shape_cast %94 : vector<128xf32> to vector<1x128xf32>
      %c0_48 = arith.constant 0 : index
      %c10 = arith.constant 10 : index
      %96 = arith.index_cast %arg5 : i32 to index
      %c0_49 = arith.constant 0 : index
      %97 = vector.load %arg4[%c0_48, %c10, %96, %c0_49] : memref<1x49x16x128xf32, #tpu.memory_space<vmem>>, vector<1x1x1x128xf32>
      %98 = vector.shape_cast %97 : vector<1x1x1x128xf32> to vector<1x128xf32>
      %99 = vector.shape_cast %95 : vector<1x128xf32> to vector<1x1x1x128xf32>
      tpu.vector_store %arg4[%c0_48, %c10, %96, %c0_49], %99 {strides = array<i32>} : memref<1x49x16x128xf32, #tpu.memory_space<vmem>>, vector<1x1x1x128xf32>,
      %c124_i32_50 = arith.constant 124 : i32
      %100 = tpu.dynamic_rotate %68 by %c124_i32_50 dim 1 : vector<32x128xf32>, i32 -> vector<32x128xf32>
      %101 = arith.mulf %5, %100 : vector<32x128xf32>
      %cst_51 = arith.constant dense<0.000000e+00> : vector<128xf32>
      %102 = vector.multi_reduction <add>, %101, %cst_51 [0] : vector<32x128xf32> to vector<128xf32>
      %103 = vector.shape_cast %102 : vector<128xf32> to vector<1x128xf32>
      %c0_52 = arith.constant 0 : index
      %c11 = arith.constant 11 : index
      %104 = arith.index_cast %arg5 : i32 to index
      %c0_53 = arith.constant 0 : index
      %105 = vector.load %arg4[%c0_52, %c11, %104, %c0_53] : memref<1x49x16x128xf32, #tpu.memory_space<vmem>>, vector<1x1x1x128xf32>
      %106 = vector.shape_cast %105 : vector<1x1x1x128xf32> to vector<1x128xf32>
      %107 = vector.shape_cast %103 : vector<1x128xf32> to vector<1x1x1x128xf32>
      tpu.vector_store %arg4[%c0_52, %c11, %104, %c0_53], %107 {strides = array<i32>} : memref<1x49x16x128xf32, #tpu.memory_space<vmem>>, vector<1x1x1x128xf32>,
      %c123_i32_54 = arith.constant 123 : i32
      %108 = tpu.dynamic_rotate %68 by %c123_i32_54 dim 1 : vector<32x128xf32>, i32 -> vector<32x128xf32>
      %109 = arith.mulf %5, %108 : vector<32x128xf32>
      %cst_55 = arith.constant dense<0.000000e+00> : vector<128xf32>
      %110 = vector.multi_reduction <add>, %109, %cst_55 [0] : vector<32x128xf32> to vector<128xf32>
      %111 = vector.shape_cast %110 : vector<128xf32> to vector<1x128xf32>
      %c0_56 = arith.constant 0 : index
      %c12 = arith.constant 12 : index
      %112 = arith.index_cast %arg5 : i32 to index
      %c0_57 = arith.constant 0 : index
      %113 = vector.load %arg4[%c0_56, %c12, %112, %c0_57] : memref<1x49x16x128xf32, #tpu.memory_space<vmem>>, vector<1x1x1x128xf32>
      %114 = vector.shape_cast %113 : vector<1x1x1x128xf32> to vector<1x128xf32>
      %115 = vector.shape_cast %111 : vector<1x128xf32> to vector<1x1x1x128xf32>
      tpu.vector_store %arg4[%c0_56, %c12, %112, %c0_57], %115 {strides = array<i32>} : memref<1x49x16x128xf32, #tpu.memory_space<vmem>>, vector<1x1x1x128xf32>,
      %c122_i32_58 = arith.constant 122 : i32
      %116 = tpu.dynamic_rotate %68 by %c122_i32_58 dim 1 : vector<32x128xf32>, i32 -> vector<32x128xf32>
      %117 = arith.mulf %5, %116 : vector<32x128xf32>
      %cst_59 = arith.constant dense<0.000000e+00> : vector<128xf32>
      %118 = vector.multi_reduction <add>, %117, %cst_59 [0] : vector<32x128xf32> to vector<128xf32>
      %119 = vector.shape_cast %118 : vector<128xf32> to vector<1x128xf32>
      %c0_60 = arith.constant 0 : index
      %c13 = arith.constant 13 : index
      %120 = arith.index_cast %arg5 : i32 to index
      %c0_61 = arith.constant 0 : index
      %121 = vector.load %arg4[%c0_60, %c13, %120, %c0_61] : memref<1x49x16x128xf32, #tpu.memory_space<vmem>>, vector<1x1x1x128xf32>
      %122 = vector.shape_cast %121 : vector<1x1x1x128xf32> to vector<1x128xf32>
      %123 = vector.shape_cast %119 : vector<1x128xf32> to vector<1x1x1x128xf32>
      tpu.vector_store %arg4[%c0_60, %c13, %120, %c0_61], %123 {strides = array<i32>} : memref<1x49x16x128xf32, #tpu.memory_space<vmem>>, vector<1x1x1x128xf32>,
      %c2_i32 = arith.constant 2 : i32
      %124 = arith.addi %arg5, %c2_i32 : i32
      %c0_62 = arith.constant 0 : index
      %c0_63 = arith.constant 0 : index
      %125 = arith.index_cast %124 : i32 to index
      %c0_64 = arith.constant 0 : index
      %c0_65 = arith.constant 0 : index
      %126 = vector.load %arg3[%c0_62, %c0_63, %125, %c0_64, %c0_65] : memref<1x1x22x32x128xf32, #tpu.memory_space<vmem>>, vector<1x1x1x32x128xf32>
      %127 = vector.shape_cast %126 : vector<1x1x1x32x128xf32> to vector<32x128xf32>
      %128 = arith.mulf %5, %127 : vector<32x128xf32>
      %cst_66 = arith.constant dense<0.000000e+00> : vector<128xf32>
      %129 = vector.multi_reduction <add>, %128, %cst_66 [0] : vector<32x128xf32> to vector<128xf32>
      %130 = vector.shape_cast %129 : vector<128xf32> to vector<1x128xf32>
      %c0_67 = arith.constant 0 : index
      %c14 = arith.constant 14 : index
      %131 = arith.index_cast %arg5 : i32 to index
      %c0_68 = arith.constant 0 : index
      %132 = vector.load %arg4[%c0_67, %c14, %131, %c0_68] : memref<1x49x16x128xf32, #tpu.memory_space<vmem>>, vector<1x1x1x128xf32>
      %133 = vector.shape_cast %132 : vector<1x1x1x128xf32> to vector<1x128xf32>
      %134 = vector.shape_cast %130 : vector<1x128xf32> to vector<1x1x1x128xf32>
      tpu.vector_store %arg4[%c0_67, %c14, %131, %c0_68], %134 {strides = array<i32>} : memref<1x49x16x128xf32, #tpu.memory_space<vmem>>, vector<1x1x1x128xf32>,
      %c127_i32_69 = arith.constant 127 : i32
      %135 = tpu.dynamic_rotate %127 by %c127_i32_69 dim 1 : vector<32x128xf32>, i32 -> vector<32x128xf32>
      %136 = arith.mulf %5, %135 : vector<32x128xf32>
      %cst_70 = arith.constant dense<0.000000e+00> : vector<128xf32>
      %137 = vector.multi_reduction <add>, %136, %cst_70 [0] : vector<32x128xf32> to vector<128xf32>
      %138 = vector.shape_cast %137 : vector<128xf32> to vector<1x128xf32>
      %c0_71 = arith.constant 0 : index
      %c15 = arith.constant 15 : index
      %139 = arith.index_cast %arg5 : i32 to index
      %c0_72 = arith.constant 0 : index
      %140 = vector.load %arg4[%c0_71, %c15, %139, %c0_72] : memref<1x49x16x128xf32, #tpu.memory_space<vmem>>, vector<1x1x1x128xf32>
      %141 = vector.shape_cast %140 : vector<1x1x1x128xf32> to vector<1x128xf32>
      %142 = vector.shape_cast %138 : vector<1x128xf32> to vector<1x1x1x128xf32>
      tpu.vector_store %arg4[%c0_71, %c15, %139, %c0_72], %142 {strides = array<i32>} : memref<1x49x16x128xf32, #tpu.memory_space<vmem>>, vector<1x1x1x128xf32>,
      %c126_i32_73 = arith.constant 126 : i32
      %143 = tpu.dynamic_rotate %127 by %c126_i32_73 dim 1 : vector<32x128xf32>, i32 -> vector<32x128xf32>
      %144 = arith.mulf %5, %143 : vector<32x128xf32>
      %cst_74 = arith.constant dense<0.000000e+00> : vector<128xf32>
      %145 = vector.multi_reduction <add>, %144, %cst_74 [0] : vector<32x128xf32> to vector<128xf32>
      %146 = vector.shape_cast %145 : vector<128xf32> to vector<1x128xf32>
      %c0_75 = arith.constant 0 : index
      %c16 = arith.constant 16 : index
      %147 = arith.index_cast %arg5 : i32 to index
      %c0_76 = arith.constant 0 : index
      %148 = vector.load %arg4[%c0_75, %c16, %147, %c0_76] : memref<1x49x16x128xf32, #tpu.memory_space<vmem>>, vector<1x1x1x128xf32>
      %149 = vector.shape_cast %148 : vector<1x1x1x128xf32> to vector<1x128xf32>
      %150 = vector.shape_cast %146 : vector<1x128xf32> to vector<1x1x1x128xf32>
      tpu.vector_store %arg4[%c0_75, %c16, %147, %c0_76], %150 {strides = array<i32>} : memref<1x49x16x128xf32, #tpu.memory_space<vmem>>, vector<1x1x1x128xf32>,
      %c125_i32_77 = arith.constant 125 : i32
      %151 = tpu.dynamic_rotate %127 by %c125_i32_77 dim 1 : vector<32x128xf32>, i32 -> vector<32x128xf32>
      %152 = arith.mulf %5, %151 : vector<32x128xf32>
      %cst_78 = arith.constant dense<0.000000e+00> : vector<128xf32>
      %153 = vector.multi_reduction <add>, %152, %cst_78 [0] : vector<32x128xf32> to vector<128xf32>
      %154 = vector.shape_cast %153 : vector<128xf32> to vector<1x128xf32>
      %c0_79 = arith.constant 0 : index
      %c17 = arith.constant 17 : index
      %155 = arith.index_cast %arg5 : i32 to index
      %c0_80 = arith.constant 0 : index
      %156 = vector.load %arg4[%c0_79, %c17, %155, %c0_80] : memref<1x49x16x128xf32, #tpu.memory_space<vmem>>, vector<1x1x1x128xf32>
      %157 = vector.shape_cast %156 : vector<1x1x1x128xf32> to vector<1x128xf32>
      %158 = vector.shape_cast %154 : vector<1x128xf32> to vector<1x1x1x128xf32>
      tpu.vector_store %arg4[%c0_79, %c17, %155, %c0_80], %158 {strides = array<i32>} : memref<1x49x16x128xf32, #tpu.memory_space<vmem>>, vector<1x1x1x128xf32>,
      %c124_i32_81 = arith.constant 124 : i32
      %159 = tpu.dynamic_rotate %127 by %c124_i32_81 dim 1 : vector<32x128xf32>, i32 -> vector<32x128xf32>
      %160 = arith.mulf %5, %159 : vector<32x128xf32>
      %cst_82 = arith.constant dense<0.000000e+00> : vector<128xf32>
      %161 = vector.multi_reduction <add>, %160, %cst_82 [0] : vector<32x128xf32> to vector<128xf32>
      %162 = vector.shape_cast %161 : vector<128xf32> to vector<1x128xf32>
      %c0_83 = arith.constant 0 : index
      %c18 = arith.constant 18 : index
      %163 = arith.index_cast %arg5 : i32 to index
      %c0_84 = arith.constant 0 : index
      %164 = vector.load %arg4[%c0_83, %c18, %163, %c0_84] : memref<1x49x16x128xf32, #tpu.memory_space<vmem>>, vector<1x1x1x128xf32>
      %165 = vector.shape_cast %164 : vector<1x1x1x128xf32> to vector<1x128xf32>
      %166 = vector.shape_cast %162 : vector<1x128xf32> to vector<1x1x1x128xf32>
      tpu.vector_store %arg4[%c0_83, %c18, %163, %c0_84], %166 {strides = array<i32>} : memref<1x49x16x128xf32, #tpu.memory_space<vmem>>, vector<1x1x1x128xf32>,
      %c123_i32_85 = arith.constant 123 : i32
      %167 = tpu.dynamic_rotate %127 by %c123_i32_85 dim 1 : vector<32x128xf32>, i32 -> vector<32x128xf32>
      %168 = arith.mulf %5, %167 : vector<32x128xf32>
      %cst_86 = arith.constant dense<0.000000e+00> : vector<128xf32>
      %169 = vector.multi_reduction <add>, %168, %cst_86 [0] : vector<32x128xf32> to vector<128xf32>
      %170 = vector.shape_cast %169 : vector<128xf32> to vector<1x128xf32>
      %c0_87 = arith.constant 0 : index
      %c19 = arith.constant 19 : index
      %171 = arith.index_cast %arg5 : i32 to index
      %c0_88 = arith.constant 0 : index
      %172 = vector.load %arg4[%c0_87, %c19, %171, %c0_88] : memref<1x49x16x128xf32, #tpu.memory_space<vmem>>, vector<1x1x1x128xf32>
      %173 = vector.shape_cast %172 : vector<1x1x1x128xf32> to vector<1x128xf32>
      %174 = vector.shape_cast %170 : vector<1x128xf32> to vector<1x1x1x128xf32>
      tpu.vector_store %arg4[%c0_87, %c19, %171, %c0_88], %174 {strides = array<i32>} : memref<1x49x16x128xf32, #tpu.memory_space<vmem>>, vector<1x1x1x128xf32>,
      %c122_i32_89 = arith.constant 122 : i32
      %175 = tpu.dynamic_rotate %127 by %c122_i32_89 dim 1 : vector<32x128xf32>, i32 -> vector<32x128xf32>
      %176 = arith.mulf %5, %175 : vector<32x128xf32>
      %cst_90 = arith.constant dense<0.000000e+00> : vector<128xf32>
      %177 = vector.multi_reduction <add>, %176, %cst_90 [0] : vector<32x128xf32> to vector<128xf32>
      %178 = vector.shape_cast %177 : vector<128xf32> to vector<1x128xf32>
      %c0_91 = arith.constant 0 : index
      %c20 = arith.constant 20 : index
      %179 = arith.index_cast %arg5 : i32 to index
      %c0_92 = arith.constant 0 : index
      %180 = vector.load %arg4[%c0_91, %c20, %179, %c0_92] : memref<1x49x16x128xf32, #tpu.memory_space<vmem>>, vector<1x1x1x128xf32>
      %181 = vector.shape_cast %180 : vector<1x1x1x128xf32> to vector<1x128xf32>
      %182 = vector.shape_cast %178 : vector<1x128xf32> to vector<1x1x1x128xf32>
      tpu.vector_store %arg4[%c0_91, %c20, %179, %c0_92], %182 {strides = array<i32>} : memref<1x49x16x128xf32, #tpu.memory_space<vmem>>, vector<1x1x1x128xf32>,
      %c3_i32 = arith.constant 3 : i32
      %183 = arith.addi %arg5, %c3_i32 : i32
      %c0_93 = arith.constant 0 : index
      %c0_94 = arith.constant 0 : index
      %184 = arith.index_cast %183 : i32 to index
      %c0_95 = arith.constant 0 : index
      %c0_96 = arith.constant 0 : index
      %185 = vector.load %arg3[%c0_93, %c0_94, %184, %c0_95, %c0_96] : memref<1x1x22x32x128xf32, #tpu.memory_space<vmem>>, vector<1x1x1x32x128xf32>
      %186 = vector.shape_cast %185 : vector<1x1x1x32x128xf32> to vector<32x128xf32>
      %187 = arith.mulf %5, %186 : vector<32x128xf32>
      %cst_97 = arith.constant dense<0.000000e+00> : vector<128xf32>
      %188 = vector.multi_reduction <add>, %187, %cst_97 [0] : vector<32x128xf32> to vector<128xf32>
      %189 = vector.shape_cast %188 : vector<128xf32> to vector<1x128xf32>
      %c0_98 = arith.constant 0 : index
      %c21 = arith.constant 21 : index
      %190 = arith.index_cast %arg5 : i32 to index
      %c0_99 = arith.constant 0 : index
      %191 = vector.load %arg4[%c0_98, %c21, %190, %c0_99] : memref<1x49x16x128xf32, #tpu.memory_space<vmem>>, vector<1x1x1x128xf32>
      %192 = vector.shape_cast %191 : vector<1x1x1x128xf32> to vector<1x128xf32>
      %193 = vector.shape_cast %189 : vector<1x128xf32> to vector<1x1x1x128xf32>
      tpu.vector_store %arg4[%c0_98, %c21, %190, %c0_99], %193 {strides = array<i32>} : memref<1x49x16x128xf32, #tpu.memory_space<vmem>>, vector<1x1x1x128xf32>,
      %c127_i32_100 = arith.constant 127 : i32
      %194 = tpu.dynamic_rotate %186 by %c127_i32_100 dim 1 : vector<32x128xf32>, i32 -> vector<32x128xf32>
      %195 = arith.mulf %5, %194 : vector<32x128xf32>
      %cst_101 = arith.constant dense<0.000000e+00> : vector<128xf32>
      %196 = vector.multi_reduction <add>, %195, %cst_101 [0] : vector<32x128xf32> to vector<128xf32>
      %197 = vector.shape_cast %196 : vector<128xf32> to vector<1x128xf32>
      %c0_102 = arith.constant 0 : index
      %c22 = arith.constant 22 : index
      %198 = arith.index_cast %arg5 : i32 to index
      %c0_103 = arith.constant 0 : index
      %199 = vector.load %arg4[%c0_102, %c22, %198, %c0_103] : memref<1x49x16x128xf32, #tpu.memory_space<vmem>>, vector<1x1x1x128xf32>
      %200 = vector.shape_cast %199 : vector<1x1x1x128xf32> to vector<1x128xf32>
      %201 = vector.shape_cast %197 : vector<1x128xf32> to vector<1x1x1x128xf32>
      tpu.vector_store %arg4[%c0_102, %c22, %198, %c0_103], %201 {strides = array<i32>} : memref<1x49x16x128xf32, #tpu.memory_space<vmem>>, vector<1x1x1x128xf32>,
      %c126_i32_104 = arith.constant 126 : i32
      %202 = tpu.dynamic_rotate %186 by %c126_i32_104 dim 1 : vector<32x128xf32>, i32 -> vector<32x128xf32>
      %203 = arith.mulf %5, %202 : vector<32x128xf32>
      %cst_105 = arith.constant dense<0.000000e+00> : vector<128xf32>
      %204 = vector.multi_reduction <add>, %203, %cst_105 [0] : vector<32x128xf32> to vector<128xf32>
      %205 = vector.shape_cast %204 : vector<128xf32> to vector<1x128xf32>
      %c0_106 = arith.constant 0 : index
      %c23 = arith.constant 23 : index
      %206 = arith.index_cast %arg5 : i32 to index
      %c0_107 = arith.constant 0 : index
      %207 = vector.load %arg4[%c0_106, %c23, %206, %c0_107] : memref<1x49x16x128xf32, #tpu.memory_space<vmem>>, vector<1x1x1x128xf32>
      %208 = vector.shape_cast %207 : vector<1x1x1x128xf32> to vector<1x128xf32>
      %209 = vector.shape_cast %205 : vector<1x128xf32> to vector<1x1x1x128xf32>
      tpu.vector_store %arg4[%c0_106, %c23, %206, %c0_107], %209 {strides = array<i32>} : memref<1x49x16x128xf32, #tpu.memory_space<vmem>>, vector<1x1x1x128xf32>,
      %c125_i32_108 = arith.constant 125 : i32
      %210 = tpu.dynamic_rotate %186 by %c125_i32_108 dim 1 : vector<32x128xf32>, i32 -> vector<32x128xf32>
      %211 = arith.mulf %5, %210 : vector<32x128xf32>
      %cst_109 = arith.constant dense<0.000000e+00> : vector<128xf32>
      %212 = vector.multi_reduction <add>, %211, %cst_109 [0] : vector<32x128xf32> to vector<128xf32>
      %213 = vector.shape_cast %212 : vector<128xf32> to vector<1x128xf32>
      %c0_110 = arith.constant 0 : index
      %c24 = arith.constant 24 : index
      %214 = arith.index_cast %arg5 : i32 to index
      %c0_111 = arith.constant 0 : index
      %215 = vector.load %arg4[%c0_110, %c24, %214, %c0_111] : memref<1x49x16x128xf32, #tpu.memory_space<vmem>>, vector<1x1x1x128xf32>
      %216 = vector.shape_cast %215 : vector<1x1x1x128xf32> to vector<1x128xf32>
      %217 = vector.shape_cast %213 : vector<1x128xf32> to vector<1x1x1x128xf32>
      tpu.vector_store %arg4[%c0_110, %c24, %214, %c0_111], %217 {strides = array<i32>} : memref<1x49x16x128xf32, #tpu.memory_space<vmem>>, vector<1x1x1x128xf32>,
      %c124_i32_112 = arith.constant 124 : i32
      %218 = tpu.dynamic_rotate %186 by %c124_i32_112 dim 1 : vector<32x128xf32>, i32 -> vector<32x128xf32>
      %219 = arith.mulf %5, %218 : vector<32x128xf32>
      %cst_113 = arith.constant dense<0.000000e+00> : vector<128xf32>
      %220 = vector.multi_reduction <add>, %219, %cst_113 [0] : vector<32x128xf32> to vector<128xf32>
      %221 = vector.shape_cast %220 : vector<128xf32> to vector<1x128xf32>
      %c0_114 = arith.constant 0 : index
      %c25 = arith.constant 25 : index
      %222 = arith.index_cast %arg5 : i32 to index
      %c0_115 = arith.constant 0 : index
      %223 = vector.load %arg4[%c0_114, %c25, %222, %c0_115] : memref<1x49x16x128xf32, #tpu.memory_space<vmem>>, vector<1x1x1x128xf32>
      %224 = vector.shape_cast %223 : vector<1x1x1x128xf32> to vector<1x128xf32>
      %225 = vector.shape_cast %221 : vector<1x128xf32> to vector<1x1x1x128xf32>
      tpu.vector_store %arg4[%c0_114, %c25, %222, %c0_115], %225 {strides = array<i32>} : memref<1x49x16x128xf32, #tpu.memory_space<vmem>>, vector<1x1x1x128xf32>,
      %c123_i32_116 = arith.constant 123 : i32
      %226 = tpu.dynamic_rotate %186 by %c123_i32_116 dim 1 : vector<32x128xf32>, i32 -> vector<32x128xf32>
      %227 = arith.mulf %5, %226 : vector<32x128xf32>
      %cst_117 = arith.constant dense<0.000000e+00> : vector<128xf32>
      %228 = vector.multi_reduction <add>, %227, %cst_117 [0] : vector<32x128xf32> to vector<128xf32>
      %229 = vector.shape_cast %228 : vector<128xf32> to vector<1x128xf32>
      %c0_118 = arith.constant 0 : index
      %c26 = arith.constant 26 : index
      %230 = arith.index_cast %arg5 : i32 to index
      %c0_119 = arith.constant 0 : index
      %231 = vector.load %arg4[%c0_118, %c26, %230, %c0_119] : memref<1x49x16x128xf32, #tpu.memory_space<vmem>>, vector<1x1x1x128xf32>
      %232 = vector.shape_cast %231 : vector<1x1x1x128xf32> to vector<1x128xf32>
      %233 = vector.shape_cast %229 : vector<1x128xf32> to vector<1x1x1x128xf32>
      tpu.vector_store %arg4[%c0_118, %c26, %230, %c0_119], %233 {strides = array<i32>} : memref<1x49x16x128xf32, #tpu.memory_space<vmem>>, vector<1x1x1x128xf32>,
      %c122_i32_120 = arith.constant 122 : i32
      %234 = tpu.dynamic_rotate %186 by %c122_i32_120 dim 1 : vector<32x128xf32>, i32 -> vector<32x128xf32>
      %235 = arith.mulf %5, %234 : vector<32x128xf32>
      %cst_121 = arith.constant dense<0.000000e+00> : vector<128xf32>
      %236 = vector.multi_reduction <add>, %235, %cst_121 [0] : vector<32x128xf32> to vector<128xf32>
      %237 = vector.shape_cast %236 : vector<128xf32> to vector<1x128xf32>
      %c0_122 = arith.constant 0 : index
      %c27 = arith.constant 27 : index
      %238 = arith.index_cast %arg5 : i32 to index
      %c0_123 = arith.constant 0 : index
      %239 = vector.load %arg4[%c0_122, %c27, %238, %c0_123] : memref<1x49x16x128xf32, #tpu.memory_space<vmem>>, vector<1x1x1x128xf32>
      %240 = vector.shape_cast %239 : vector<1x1x1x128xf32> to vector<1x128xf32>
      %241 = vector.shape_cast %237 : vector<1x128xf32> to vector<1x1x1x128xf32>
      tpu.vector_store %arg4[%c0_122, %c27, %238, %c0_123], %241 {strides = array<i32>} : memref<1x49x16x128xf32, #tpu.memory_space<vmem>>, vector<1x1x1x128xf32>,
      %c4_i32 = arith.constant 4 : i32
      %242 = arith.addi %arg5, %c4_i32 : i32
      %c0_124 = arith.constant 0 : index
      %c0_125 = arith.constant 0 : index
      %243 = arith.index_cast %242 : i32 to index
      %c0_126 = arith.constant 0 : index
      %c0_127 = arith.constant 0 : index
      %244 = vector.load %arg3[%c0_124, %c0_125, %243, %c0_126, %c0_127] : memref<1x1x22x32x128xf32, #tpu.memory_space<vmem>>, vector<1x1x1x32x128xf32>
      %245 = vector.shape_cast %244 : vector<1x1x1x32x128xf32> to vector<32x128xf32>
      %246 = arith.mulf %5, %245 : vector<32x128xf32>
      %cst_128 = arith.constant dense<0.000000e+00> : vector<128xf32>
      %247 = vector.multi_reduction <add>, %246, %cst_128 [0] : vector<32x128xf32> to vector<128xf32>
      %248 = vector.shape_cast %247 : vector<128xf32> to vector<1x128xf32>
      %c0_129 = arith.constant 0 : index
      %c28 = arith.constant 28 : index
      %249 = arith.index_cast %arg5 : i32 to index
      %c0_130 = arith.constant 0 : index
      %250 = vector.load %arg4[%c0_129, %c28, %249, %c0_130] : memref<1x49x16x128xf32, #tpu.memory_space<vmem>>, vector<1x1x1x128xf32>
      %251 = vector.shape_cast %250 : vector<1x1x1x128xf32> to vector<1x128xf32>
      %252 = vector.shape_cast %248 : vector<1x128xf32> to vector<1x1x1x128xf32>
      tpu.vector_store %arg4[%c0_129, %c28, %249, %c0_130], %252 {strides = array<i32>} : memref<1x49x16x128xf32, #tpu.memory_space<vmem>>, vector<1x1x1x128xf32>,
      %c127_i32_131 = arith.constant 127 : i32
      %253 = tpu.dynamic_rotate %245 by %c127_i32_131 dim 1 : vector<32x128xf32>, i32 -> vector<32x128xf32>
      %254 = arith.mulf %5, %253 : vector<32x128xf32>
      %cst_132 = arith.constant dense<0.000000e+00> : vector<128xf32>
      %255 = vector.multi_reduction <add>, %254, %cst_132 [0] : vector<32x128xf32> to vector<128xf32>
      %256 = vector.shape_cast %255 : vector<128xf32> to vector<1x128xf32>
      %c0_133 = arith.constant 0 : index
      %c29 = arith.constant 29 : index
      %257 = arith.index_cast %arg5 : i32 to index
      %c0_134 = arith.constant 0 : index
      %258 = vector.load %arg4[%c0_133, %c29, %257, %c0_134] : memref<1x49x16x128xf32, #tpu.memory_space<vmem>>, vector<1x1x1x128xf32>
      %259 = vector.shape_cast %258 : vector<1x1x1x128xf32> to vector<1x128xf32>
      %260 = vector.shape_cast %256 : vector<1x128xf32> to vector<1x1x1x128xf32>
      tpu.vector_store %arg4[%c0_133, %c29, %257, %c0_134], %260 {strides = array<i32>} : memref<1x49x16x128xf32, #tpu.memory_space<vmem>>, vector<1x1x1x128xf32>,
      %c126_i32_135 = arith.constant 126 : i32
      %261 = tpu.dynamic_rotate %245 by %c126_i32_135 dim 1 : vector<32x128xf32>, i32 -> vector<32x128xf32>
      %262 = arith.mulf %5, %261 : vector<32x128xf32>
      %cst_136 = arith.constant dense<0.000000e+00> : vector<128xf32>
      %263 = vector.multi_reduction <add>, %262, %cst_136 [0] : vector<32x128xf32> to vector<128xf32>
      %264 = vector.shape_cast %263 : vector<128xf32> to vector<1x128xf32>
      %c0_137 = arith.constant 0 : index
      %c30 = arith.constant 30 : index
      %265 = arith.index_cast %arg5 : i32 to index
      %c0_138 = arith.constant 0 : index
      %266 = vector.load %arg4[%c0_137, %c30, %265, %c0_138] : memref<1x49x16x128xf32, #tpu.memory_space<vmem>>, vector<1x1x1x128xf32>
      %267 = vector.shape_cast %266 : vector<1x1x1x128xf32> to vector<1x128xf32>
      %268 = vector.shape_cast %264 : vector<1x128xf32> to vector<1x1x1x128xf32>
      tpu.vector_store %arg4[%c0_137, %c30, %265, %c0_138], %268 {strides = array<i32>} : memref<1x49x16x128xf32, #tpu.memory_space<vmem>>, vector<1x1x1x128xf32>,
      %c125_i32_139 = arith.constant 125 : i32
      %269 = tpu.dynamic_rotate %245 by %c125_i32_139 dim 1 : vector<32x128xf32>, i32 -> vector<32x128xf32>
      %270 = arith.mulf %5, %269 : vector<32x128xf32>
      %cst_140 = arith.constant dense<0.000000e+00> : vector<128xf32>
      %271 = vector.multi_reduction <add>, %270, %cst_140 [0] : vector<32x128xf32> to vector<128xf32>
      %272 = vector.shape_cast %271 : vector<128xf32> to vector<1x128xf32>
      %c0_141 = arith.constant 0 : index
      %c31 = arith.constant 31 : index
      %273 = arith.index_cast %arg5 : i32 to index
      %c0_142 = arith.constant 0 : index
      %274 = vector.load %arg4[%c0_141, %c31, %273, %c0_142] : memref<1x49x16x128xf32, #tpu.memory_space<vmem>>, vector<1x1x1x128xf32>
      %275 = vector.shape_cast %274 : vector<1x1x1x128xf32> to vector<1x128xf32>
      %276 = vector.shape_cast %272 : vector<1x128xf32> to vector<1x1x1x128xf32>
      tpu.vector_store %arg4[%c0_141, %c31, %273, %c0_142], %276 {strides = array<i32>} : memref<1x49x16x128xf32, #tpu.memory_space<vmem>>, vector<1x1x1x128xf32>,
      %c124_i32_143 = arith.constant 124 : i32
      %277 = tpu.dynamic_rotate %245 by %c124_i32_143 dim 1 : vector<32x128xf32>, i32 -> vector<32x128xf32>
      %278 = arith.mulf %5, %277 : vector<32x128xf32>
      %cst_144 = arith.constant dense<0.000000e+00> : vector<128xf32>
      %279 = vector.multi_reduction <add>, %278, %cst_144 [0] : vector<32x128xf32> to vector<128xf32>
      %280 = vector.shape_cast %279 : vector<128xf32> to vector<1x128xf32>
      %c0_145 = arith.constant 0 : index
      %c32 = arith.constant 32 : index
      %281 = arith.index_cast %arg5 : i32 to index
      %c0_146 = arith.constant 0 : index
      %282 = vector.load %arg4[%c0_145, %c32, %281, %c0_146] : memref<1x49x16x128xf32, #tpu.memory_space<vmem>>, vector<1x1x1x128xf32>
      %283 = vector.shape_cast %282 : vector<1x1x1x128xf32> to vector<1x128xf32>
      %284 = vector.shape_cast %280 : vector<1x128xf32> to vector<1x1x1x128xf32>
      tpu.vector_store %arg4[%c0_145, %c32, %281, %c0_146], %284 {strides = array<i32>} : memref<1x49x16x128xf32, #tpu.memory_space<vmem>>, vector<1x1x1x128xf32>,
      %c123_i32_147 = arith.constant 123 : i32
      %285 = tpu.dynamic_rotate %245 by %c123_i32_147 dim 1 : vector<32x128xf32>, i32 -> vector<32x128xf32>
      %286 = arith.mulf %5, %285 : vector<32x128xf32>
      %cst_148 = arith.constant dense<0.000000e+00> : vector<128xf32>
      %287 = vector.multi_reduction <add>, %286, %cst_148 [0] : vector<32x128xf32> to vector<128xf32>
      %288 = vector.shape_cast %287 : vector<128xf32> to vector<1x128xf32>
      %c0_149 = arith.constant 0 : index
      %c33 = arith.constant 33 : index
      %289 = arith.index_cast %arg5 : i32 to index
      %c0_150 = arith.constant 0 : index
      %290 = vector.load %arg4[%c0_149, %c33, %289, %c0_150] : memref<1x49x16x128xf32, #tpu.memory_space<vmem>>, vector<1x1x1x128xf32>
      %291 = vector.shape_cast %290 : vector<1x1x1x128xf32> to vector<1x128xf32>
      %292 = vector.shape_cast %288 : vector<1x128xf32> to vector<1x1x1x128xf32>
      tpu.vector_store %arg4[%c0_149, %c33, %289, %c0_150], %292 {strides = array<i32>} : memref<1x49x16x128xf32, #tpu.memory_space<vmem>>, vector<1x1x1x128xf32>,
      %c122_i32_151 = arith.constant 122 : i32
      %293 = tpu.dynamic_rotate %245 by %c122_i32_151 dim 1 : vector<32x128xf32>, i32 -> vector<32x128xf32>
      %294 = arith.mulf %5, %293 : vector<32x128xf32>
      %cst_152 = arith.constant dense<0.000000e+00> : vector<128xf32>
      %295 = vector.multi_reduction <add>, %294, %cst_152 [0] : vector<32x128xf32> to vector<128xf32>
      %296 = vector.shape_cast %295 : vector<128xf32> to vector<1x128xf32>
      %c0_153 = arith.constant 0 : index
      %c34 = arith.constant 34 : index
      %297 = arith.index_cast %arg5 : i32 to index
      %c0_154 = arith.constant 0 : index
      %298 = vector.load %arg4[%c0_153, %c34, %297, %c0_154] : memref<1x49x16x128xf32, #tpu.memory_space<vmem>>, vector<1x1x1x128xf32>
      %299 = vector.shape_cast %298 : vector<1x1x1x128xf32> to vector<1x128xf32>
      %300 = vector.shape_cast %296 : vector<1x128xf32> to vector<1x1x1x128xf32>
      tpu.vector_store %arg4[%c0_153, %c34, %297, %c0_154], %300 {strides = array<i32>} : memref<1x49x16x128xf32, #tpu.memory_space<vmem>>, vector<1x1x1x128xf32>,
      %c5_i32 = arith.constant 5 : i32
      %301 = arith.addi %arg5, %c5_i32 : i32
      %c0_155 = arith.constant 0 : index
      %c0_156 = arith.constant 0 : index
      %302 = arith.index_cast %301 : i32 to index
      %c0_157 = arith.constant 0 : index
      %c0_158 = arith.constant 0 : index
      %303 = vector.load %arg3[%c0_155, %c0_156, %302, %c0_157, %c0_158] : memref<1x1x22x32x128xf32, #tpu.memory_space<vmem>>, vector<1x1x1x32x128xf32>
      %304 = vector.shape_cast %303 : vector<1x1x1x32x128xf32> to vector<32x128xf32>
      %305 = arith.mulf %5, %304 : vector<32x128xf32>
      %cst_159 = arith.constant dense<0.000000e+00> : vector<128xf32>
      %306 = vector.multi_reduction <add>, %305, %cst_159 [0] : vector<32x128xf32> to vector<128xf32>
      %307 = vector.shape_cast %306 : vector<128xf32> to vector<1x128xf32>
      %c0_160 = arith.constant 0 : index
      %c35 = arith.constant 35 : index
      %308 = arith.index_cast %arg5 : i32 to index
      %c0_161 = arith.constant 0 : index
      %309 = vector.load %arg4[%c0_160, %c35, %308, %c0_161] : memref<1x49x16x128xf32, #tpu.memory_space<vmem>>, vector<1x1x1x128xf32>
      %310 = vector.shape_cast %309 : vector<1x1x1x128xf32> to vector<1x128xf32>
      %311 = vector.shape_cast %307 : vector<1x128xf32> to vector<1x1x1x128xf32>
      tpu.vector_store %arg4[%c0_160, %c35, %308, %c0_161], %311 {strides = array<i32>} : memref<1x49x16x128xf32, #tpu.memory_space<vmem>>, vector<1x1x1x128xf32>,
      %c127_i32_162 = arith.constant 127 : i32
      %312 = tpu.dynamic_rotate %304 by %c127_i32_162 dim 1 : vector<32x128xf32>, i32 -> vector<32x128xf32>
      %313 = arith.mulf %5, %312 : vector<32x128xf32>
      %cst_163 = arith.constant dense<0.000000e+00> : vector<128xf32>
      %314 = vector.multi_reduction <add>, %313, %cst_163 [0] : vector<32x128xf32> to vector<128xf32>
      %315 = vector.shape_cast %314 : vector<128xf32> to vector<1x128xf32>
      %c0_164 = arith.constant 0 : index
      %c36 = arith.constant 36 : index
      %316 = arith.index_cast %arg5 : i32 to index
      %c0_165 = arith.constant 0 : index
      %317 = vector.load %arg4[%c0_164, %c36, %316, %c0_165] : memref<1x49x16x128xf32, #tpu.memory_space<vmem>>, vector<1x1x1x128xf32>
      %318 = vector.shape_cast %317 : vector<1x1x1x128xf32> to vector<1x128xf32>
      %319 = vector.shape_cast %315 : vector<1x128xf32> to vector<1x1x1x128xf32>
      tpu.vector_store %arg4[%c0_164, %c36, %316, %c0_165], %319 {strides = array<i32>} : memref<1x49x16x128xf32, #tpu.memory_space<vmem>>, vector<1x1x1x128xf32>,
      %c126_i32_166 = arith.constant 126 : i32
      %320 = tpu.dynamic_rotate %304 by %c126_i32_166 dim 1 : vector<32x128xf32>, i32 -> vector<32x128xf32>
      %321 = arith.mulf %5, %320 : vector<32x128xf32>
      %cst_167 = arith.constant dense<0.000000e+00> : vector<128xf32>
      %322 = vector.multi_reduction <add>, %321, %cst_167 [0] : vector<32x128xf32> to vector<128xf32>
      %323 = vector.shape_cast %322 : vector<128xf32> to vector<1x128xf32>
      %c0_168 = arith.constant 0 : index
      %c37 = arith.constant 37 : index
      %324 = arith.index_cast %arg5 : i32 to index
      %c0_169 = arith.constant 0 : index
      %325 = vector.load %arg4[%c0_168, %c37, %324, %c0_169] : memref<1x49x16x128xf32, #tpu.memory_space<vmem>>, vector<1x1x1x128xf32>
      %326 = vector.shape_cast %325 : vector<1x1x1x128xf32> to vector<1x128xf32>
      %327 = vector.shape_cast %323 : vector<1x128xf32> to vector<1x1x1x128xf32>
      tpu.vector_store %arg4[%c0_168, %c37, %324, %c0_169], %327 {strides = array<i32>} : memref<1x49x16x128xf32, #tpu.memory_space<vmem>>, vector<1x1x1x128xf32>,
      %c125_i32_170 = arith.constant 125 : i32
      %328 = tpu.dynamic_rotate %304 by %c125_i32_170 dim 1 : vector<32x128xf32>, i32 -> vector<32x128xf32>
      %329 = arith.mulf %5, %328 : vector<32x128xf32>
      %cst_171 = arith.constant dense<0.000000e+00> : vector<128xf32>
      %330 = vector.multi_reduction <add>, %329, %cst_171 [0] : vector<32x128xf32> to vector<128xf32>
      %331 = vector.shape_cast %330 : vector<128xf32> to vector<1x128xf32>
      %c0_172 = arith.constant 0 : index
      %c38 = arith.constant 38 : index
      %332 = arith.index_cast %arg5 : i32 to index
      %c0_173 = arith.constant 0 : index
      %333 = vector.load %arg4[%c0_172, %c38, %332, %c0_173] : memref<1x49x16x128xf32, #tpu.memory_space<vmem>>, vector<1x1x1x128xf32>
      %334 = vector.shape_cast %333 : vector<1x1x1x128xf32> to vector<1x128xf32>
      %335 = vector.shape_cast %331 : vector<1x128xf32> to vector<1x1x1x128xf32>
      tpu.vector_store %arg4[%c0_172, %c38, %332, %c0_173], %335 {strides = array<i32>} : memref<1x49x16x128xf32, #tpu.memory_space<vmem>>, vector<1x1x1x128xf32>,
      %c124_i32_174 = arith.constant 124 : i32
      %336 = tpu.dynamic_rotate %304 by %c124_i32_174 dim 1 : vector<32x128xf32>, i32 -> vector<32x128xf32>
      %337 = arith.mulf %5, %336 : vector<32x128xf32>
      %cst_175 = arith.constant dense<0.000000e+00> : vector<128xf32>
      %338 = vector.multi_reduction <add>, %337, %cst_175 [0] : vector<32x128xf32> to vector<128xf32>
      %339 = vector.shape_cast %338 : vector<128xf32> to vector<1x128xf32>
      %c0_176 = arith.constant 0 : index
      %c39 = arith.constant 39 : index
      %340 = arith.index_cast %arg5 : i32 to index
      %c0_177 = arith.constant 0 : index
      %341 = vector.load %arg4[%c0_176, %c39, %340, %c0_177] : memref<1x49x16x128xf32, #tpu.memory_space<vmem>>, vector<1x1x1x128xf32>
      %342 = vector.shape_cast %341 : vector<1x1x1x128xf32> to vector<1x128xf32>
      %343 = vector.shape_cast %339 : vector<1x128xf32> to vector<1x1x1x128xf32>
      tpu.vector_store %arg4[%c0_176, %c39, %340, %c0_177], %343 {strides = array<i32>} : memref<1x49x16x128xf32, #tpu.memory_space<vmem>>, vector<1x1x1x128xf32>,
      %c123_i32_178 = arith.constant 123 : i32
      %344 = tpu.dynamic_rotate %304 by %c123_i32_178 dim 1 : vector<32x128xf32>, i32 -> vector<32x128xf32>
      %345 = arith.mulf %5, %344 : vector<32x128xf32>
      %cst_179 = arith.constant dense<0.000000e+00> : vector<128xf32>
      %346 = vector.multi_reduction <add>, %345, %cst_179 [0] : vector<32x128xf32> to vector<128xf32>
      %347 = vector.shape_cast %346 : vector<128xf32> to vector<1x128xf32>
      %c0_180 = arith.constant 0 : index
      %c40 = arith.constant 40 : index
      %348 = arith.index_cast %arg5 : i32 to index
      %c0_181 = arith.constant 0 : index
      %349 = vector.load %arg4[%c0_180, %c40, %348, %c0_181] : memref<1x49x16x128xf32, #tpu.memory_space<vmem>>, vector<1x1x1x128xf32>
      %350 = vector.shape_cast %349 : vector<1x1x1x128xf32> to vector<1x128xf32>
      %351 = vector.shape_cast %347 : vector<1x128xf32> to vector<1x1x1x128xf32>
      tpu.vector_store %arg4[%c0_180, %c40, %348, %c0_181], %351 {strides = array<i32>} : memref<1x49x16x128xf32, #tpu.memory_space<vmem>>, vector<1x1x1x128xf32>,
      %c122_i32_182 = arith.constant 122 : i32
      %352 = tpu.dynamic_rotate %304 by %c122_i32_182 dim 1 : vector<32x128xf32>, i32 -> vector<32x128xf32>
      %353 = arith.mulf %5, %352 : vector<32x128xf32>
      %cst_183 = arith.constant dense<0.000000e+00> : vector<128xf32>
      %354 = vector.multi_reduction <add>, %353, %cst_183 [0] : vector<32x128xf32> to vector<128xf32>
      %355 = vector.shape_cast %354 : vector<128xf32> to vector<1x128xf32>
      %c0_184 = arith.constant 0 : index
      %c41 = arith.constant 41 : index
      %356 = arith.index_cast %arg5 : i32 to index
      %c0_185 = arith.constant 0 : index
      %357 = vector.load %arg4[%c0_184, %c41, %356, %c0_185] : memref<1x49x16x128xf32, #tpu.memory_space<vmem>>, vector<1x1x1x128xf32>
      %358 = vector.shape_cast %357 : vector<1x1x1x128xf32> to vector<1x128xf32>
      %359 = vector.shape_cast %355 : vector<1x128xf32> to vector<1x1x1x128xf32>
      tpu.vector_store %arg4[%c0_184, %c41, %356, %c0_185], %359 {strides = array<i32>} : memref<1x49x16x128xf32, #tpu.memory_space<vmem>>, vector<1x1x1x128xf32>,
      %c6_i32 = arith.constant 6 : i32
      %360 = arith.addi %arg5, %c6_i32 : i32
      %c0_186 = arith.constant 0 : index
      %c0_187 = arith.constant 0 : index
      %361 = arith.index_cast %360 : i32 to index
      %c0_188 = arith.constant 0 : index
      %c0_189 = arith.constant 0 : index
      %362 = vector.load %arg3[%c0_186, %c0_187, %361, %c0_188, %c0_189] : memref<1x1x22x32x128xf32, #tpu.memory_space<vmem>>, vector<1x1x1x32x128xf32>
      %363 = vector.shape_cast %362 : vector<1x1x1x32x128xf32> to vector<32x128xf32>
      %364 = arith.mulf %5, %363 : vector<32x128xf32>
      %cst_190 = arith.constant dense<0.000000e+00> : vector<128xf32>
      %365 = vector.multi_reduction <add>, %364, %cst_190 [0] : vector<32x128xf32> to vector<128xf32>
      %366 = vector.shape_cast %365 : vector<128xf32> to vector<1x128xf32>
      %c0_191 = arith.constant 0 : index
      %c42 = arith.constant 42 : index
      %367 = arith.index_cast %arg5 : i32 to index
      %c0_192 = arith.constant 0 : index
      %368 = vector.load %arg4[%c0_191, %c42, %367, %c0_192] : memref<1x49x16x128xf32, #tpu.memory_space<vmem>>, vector<1x1x1x128xf32>
      %369 = vector.shape_cast %368 : vector<1x1x1x128xf32> to vector<1x128xf32>
      %370 = vector.shape_cast %366 : vector<1x128xf32> to vector<1x1x1x128xf32>
      tpu.vector_store %arg4[%c0_191, %c42, %367, %c0_192], %370 {strides = array<i32>} : memref<1x49x16x128xf32, #tpu.memory_space<vmem>>, vector<1x1x1x128xf32>,
      %c127_i32_193 = arith.constant 127 : i32
      %371 = tpu.dynamic_rotate %363 by %c127_i32_193 dim 1 : vector<32x128xf32>, i32 -> vector<32x128xf32>
      %372 = arith.mulf %5, %371 : vector<32x128xf32>
      %cst_194 = arith.constant dense<0.000000e+00> : vector<128xf32>
      %373 = vector.multi_reduction <add>, %372, %cst_194 [0] : vector<32x128xf32> to vector<128xf32>
      %374 = vector.shape_cast %373 : vector<128xf32> to vector<1x128xf32>
      %c0_195 = arith.constant 0 : index
      %c43 = arith.constant 43 : index
      %375 = arith.index_cast %arg5 : i32 to index
      %c0_196 = arith.constant 0 : index
      %376 = vector.load %arg4[%c0_195, %c43, %375, %c0_196] : memref<1x49x16x128xf32, #tpu.memory_space<vmem>>, vector<1x1x1x128xf32>
      %377 = vector.shape_cast %376 : vector<1x1x1x128xf32> to vector<1x128xf32>
      %378 = vector.shape_cast %374 : vector<1x128xf32> to vector<1x1x1x128xf32>
      tpu.vector_store %arg4[%c0_195, %c43, %375, %c0_196], %378 {strides = array<i32>} : memref<1x49x16x128xf32, #tpu.memory_space<vmem>>, vector<1x1x1x128xf32>,
      %c126_i32_197 = arith.constant 126 : i32
      %379 = tpu.dynamic_rotate %363 by %c126_i32_197 dim 1 : vector<32x128xf32>, i32 -> vector<32x128xf32>
      %380 = arith.mulf %5, %379 : vector<32x128xf32>
      %cst_198 = arith.constant dense<0.000000e+00> : vector<128xf32>
      %381 = vector.multi_reduction <add>, %380, %cst_198 [0] : vector<32x128xf32> to vector<128xf32>
      %382 = vector.shape_cast %381 : vector<128xf32> to vector<1x128xf32>
      %c0_199 = arith.constant 0 : index
      %c44 = arith.constant 44 : index
      %383 = arith.index_cast %arg5 : i32 to index
      %c0_200 = arith.constant 0 : index
      %384 = vector.load %arg4[%c0_199, %c44, %383, %c0_200] : memref<1x49x16x128xf32, #tpu.memory_space<vmem>>, vector<1x1x1x128xf32>
      %385 = vector.shape_cast %384 : vector<1x1x1x128xf32> to vector<1x128xf32>
      %386 = vector.shape_cast %382 : vector<1x128xf32> to vector<1x1x1x128xf32>
      tpu.vector_store %arg4[%c0_199, %c44, %383, %c0_200], %386 {strides = array<i32>} : memref<1x49x16x128xf32, #tpu.memory_space<vmem>>, vector<1x1x1x128xf32>,
      %c125_i32_201 = arith.constant 125 : i32
      %387 = tpu.dynamic_rotate %363 by %c125_i32_201 dim 1 : vector<32x128xf32>, i32 -> vector<32x128xf32>
      %388 = arith.mulf %5, %387 : vector<32x128xf32>
      %cst_202 = arith.constant dense<0.000000e+00> : vector<128xf32>
      %389 = vector.multi_reduction <add>, %388, %cst_202 [0] : vector<32x128xf32> to vector<128xf32>
      %390 = vector.shape_cast %389 : vector<128xf32> to vector<1x128xf32>
      %c0_203 = arith.constant 0 : index
      %c45 = arith.constant 45 : index
      %391 = arith.index_cast %arg5 : i32 to index
      %c0_204 = arith.constant 0 : index
      %392 = vector.load %arg4[%c0_203, %c45, %391, %c0_204] : memref<1x49x16x128xf32, #tpu.memory_space<vmem>>, vector<1x1x1x128xf32>
      %393 = vector.shape_cast %392 : vector<1x1x1x128xf32> to vector<1x128xf32>
      %394 = vector.shape_cast %390 : vector<1x128xf32> to vector<1x1x1x128xf32>
      tpu.vector_store %arg4[%c0_203, %c45, %391, %c0_204], %394 {strides = array<i32>} : memref<1x49x16x128xf32, #tpu.memory_space<vmem>>, vector<1x1x1x128xf32>,
      %c124_i32_205 = arith.constant 124 : i32
      %395 = tpu.dynamic_rotate %363 by %c124_i32_205 dim 1 : vector<32x128xf32>, i32 -> vector<32x128xf32>
      %396 = arith.mulf %5, %395 : vector<32x128xf32>
      %cst_206 = arith.constant dense<0.000000e+00> : vector<128xf32>
      %397 = vector.multi_reduction <add>, %396, %cst_206 [0] : vector<32x128xf32> to vector<128xf32>
      %398 = vector.shape_cast %397 : vector<128xf32> to vector<1x128xf32>
      %c0_207 = arith.constant 0 : index
      %c46 = arith.constant 46 : index
      %399 = arith.index_cast %arg5 : i32 to index
      %c0_208 = arith.constant 0 : index
      %400 = vector.load %arg4[%c0_207, %c46, %399, %c0_208] : memref<1x49x16x128xf32, #tpu.memory_space<vmem>>, vector<1x1x1x128xf32>
      %401 = vector.shape_cast %400 : vector<1x1x1x128xf32> to vector<1x128xf32>
      %402 = vector.shape_cast %398 : vector<1x128xf32> to vector<1x1x1x128xf32>
      tpu.vector_store %arg4[%c0_207, %c46, %399, %c0_208], %402 {strides = array<i32>} : memref<1x49x16x128xf32, #tpu.memory_space<vmem>>, vector<1x1x1x128xf32>,
      %c123_i32_209 = arith.constant 123 : i32
      %403 = tpu.dynamic_rotate %363 by %c123_i32_209 dim 1 : vector<32x128xf32>, i32 -> vector<32x128xf32>
      %404 = arith.mulf %5, %403 : vector<32x128xf32>
      %cst_210 = arith.constant dense<0.000000e+00> : vector<128xf32>
      %405 = vector.multi_reduction <add>, %404, %cst_210 [0] : vector<32x128xf32> to vector<128xf32>
      %406 = vector.shape_cast %405 : vector<128xf32> to vector<1x128xf32>
      %c0_211 = arith.constant 0 : index
      %c47 = arith.constant 47 : index
      %407 = arith.index_cast %arg5 : i32 to index
      %c0_212 = arith.constant 0 : index
      %408 = vector.load %arg4[%c0_211, %c47, %407, %c0_212] : memref<1x49x16x128xf32, #tpu.memory_space<vmem>>, vector<1x1x1x128xf32>
      %409 = vector.shape_cast %408 : vector<1x1x1x128xf32> to vector<1x128xf32>
      %410 = vector.shape_cast %406 : vector<1x128xf32> to vector<1x1x1x128xf32>
      tpu.vector_store %arg4[%c0_211, %c47, %407, %c0_212], %410 {strides = array<i32>} : memref<1x49x16x128xf32, #tpu.memory_space<vmem>>, vector<1x1x1x128xf32>,
      %c122_i32_213 = arith.constant 122 : i32
      %411 = tpu.dynamic_rotate %363 by %c122_i32_213 dim 1 : vector<32x128xf32>, i32 -> vector<32x128xf32>
      %412 = arith.mulf %5, %411 : vector<32x128xf32>
      %cst_214 = arith.constant dense<0.000000e+00> : vector<128xf32>
      %413 = vector.multi_reduction <add>, %412, %cst_214 [0] : vector<32x128xf32> to vector<128xf32>
      %414 = vector.shape_cast %413 : vector<128xf32> to vector<1x128xf32>
      %c0_215 = arith.constant 0 : index
      %c48 = arith.constant 48 : index
      %415 = arith.index_cast %arg5 : i32 to index
      %c0_216 = arith.constant 0 : index
      %416 = vector.load %arg4[%c0_215, %c48, %415, %c0_216] : memref<1x49x16x128xf32, #tpu.memory_space<vmem>>, vector<1x1x1x128xf32>
      %417 = vector.shape_cast %416 : vector<1x1x1x128xf32> to vector<1x128xf32>
      %418 = vector.shape_cast %414 : vector<1x128xf32> to vector<1x1x1x128xf32>
      tpu.vector_store %arg4[%c0_215, %c48, %415, %c0_216], %418 {strides = array<i32>} : memref<1x49x16x128xf32, #tpu.memory_space<vmem>>, vector<1x1x1x128xf32>,
    }
    %c16_i32_0 = arith.constant 16 : i32
    return
  }
  func.func @transform_0(%arg0: i32, %arg1: i32) -> (i32, i32, i32, i32) {
    %c0_i32 = arith.constant 0 : i32
    %c0_i32_0 = arith.constant 0 : i32
    %c0_i32_1 = arith.constant 0 : i32
    return %arg0, %arg1, %c0_i32, %c0_i32_0 : i32, i32, i32, i32
  }
  func.func @transform_1(%arg0: i32, %arg1: i32) -> (i32, i32, i32, i32, i32) {
    %c0_i32 = arith.constant 0 : i32
    %c0_i32_0 = arith.constant 0 : i32
    %c0_i32_1 = arith.constant 0 : i32
    %c0_i32_2 = arith.constant 0 : i32
    return %arg0, %arg1, %c0_i32, %c0_i32_0, %c0_i32_1 : i32, i32, i32, i32, i32
  }
  func.func @transform_2(%arg0: i32, %arg1: i32) -> (i32, i32, i32, i32) {
    %c0_i32 = arith.constant 0 : i32
    %c0_i32_0 = arith.constant 0 : i32
    %c0_i32_1 = arith.constant 0 : i32
    return %arg0, %c0_i32, %arg1, %c0_i32_0 : i32, i32, i32, i32
  }
}

</mosaic_0001>

<bundles_post_ra>
// kernel: tpu_custom_call.1
= control target key start
LH: loop header
LB: loop body
LE: loop exit
PB: predicated region body
PF: predicated region fallthrough
CT: control target
= control target key end

     0   :  { %7 = vsyncpa [#allocation3], 0  ;;  %s2984_s0 = inlined_call_operand.hbm [shape: f32[2,16,32,128], index: 0, kind: input, shape index: {}]   ;;  %s2985_s1 = inlined_call_operand.hbm [shape: f32[2,1,22,32,128], index: 1, kind: input, shape index: {}]   ;;  %s2986_s2 = inlined_call_operand.hbm [shape: f32[2,49,16,128], index: 2, kind: output, shape index: {}]  }
   0x1   :  { %9 = vsyncpa [#allocation3 + $0x1], 0 }
   0x2   :  { %10 = vsyncpa [#allocation6], 0 }
   0x3   :  { %12 = vsyncpa [#allocation6 + $0x1], 0 }
   0x4   :  { %13 = vsyncpa [#allocation4], 0 }
   0x5   :  { %15 = vsyncpa [#allocation4 + $0x1], 0  ;;  %s2030_s9 = smov 0   ;;  %s2032_s10 = smov 0  }
   0x6   :  { %s2034_s11 = smov 0   ;;  %s2036_s12 = smov 0  }
   0x7   :  { %s2038_s13 = smov 0   ;;  %s2040_s14 = smov 0  }
   0x8 LB: > { %s1662_s15 = sadd.s32 4294967295, %s1996_s14   ;;  %s1663_s16 = sadd.s32 4294967294, %s1996_s14   ;;  %s1996_s14 = sphi %s2040_s14, %s21_s14   ;;  %s1992_s13 = sphi %s2038_s13, %s3004_s13   ;;  %s1988_s12 = sphi %s2036_s12, %s3003_s12   ;;  %s1984_s11 = sphi %s2034_s11, %s3002_s11   ;;  %s1980_s10 = sphi %s2032_s10, %s3001_s10   ;;  %s1976_s9 = sphi %s2030_s9, %s3000_s9  }
   0x9   : > { %s33_s17 = sadd.s32 1, %s1992_s13  ;;  %s42_s18 = sadd.s32 1, %s1984_s11 }
   0xa   : > { %p35_p0 = scmp.ge.s32.totalorder %s33_s17, 2  ;;  %p49_p1 = scmp.ne.s32.totalorder %s1984_s11, %s1980_s10 }
   0xb   : > { %p50_p2 = scmp.eq.s32.totalorder %s1996_s14, 0  ;;  %p55_p3 = scmp.ne.s32.totalorder %s1980_s10, %s1976_s9 }
   0xc   : > { %s3006_s17 = smov (%p35_p0, %s33_s17), 0  ;;  %p56_p5 = scmp.eq.s32.totalorder %s1662_s15, 0 }
   0xd   : > { %p2071_p4 = por %p50_p2, %p49_p1  ;;  %s37_s20 = ssub.s32 %s1992_s13, %s3006_s17 }
   0xe   : > { %p109_p6 = scmp.eq.s32.totalorder %s1662_s15, 1  ;;  %p40_p7 = scmp.eq.s32.totalorder %s37_s20, 0 }
   0xf   : > { %p2077_p8 = por %p56_p5, %p55_p3  ;;  %p115_p10 = scmp.eq.s32.totalorder %s1663_s16, 1 }
  0x10   : > { %p2081_p9 = por %p109_p6, %p49_p1  ;;  %p1777_p13 = scmp.lt.s32.totalorder %s1996_s14, 2 }
  0x11   : > { %s2990_s21 = scalar_select %p2077_p8, 1, 0 }
  0x12   : > { %s2991_s22 = scalar_select %p2081_p9, 1, 0 }
  0x13   : > { %s2086_s23 = scalar_select %p40_p7, %s1984_s11, %s42_s18  }
  0x14   : > { %p2088_p11 = por %p115_p10, %p55_p3  ;;  %s2095_s25 = sand.u32 1, %s1984_s11  }
  0x15   : > { %s1666_s26 = sshll.u32 %s2095_s25, 9  ;;  %s1754_s27 = sshll.u32 %s1992_s13, 13 }
  0x16   : > { %s2992_s24 = scalar_select %p2088_p11, 1, 0 }
  0x17   : > { %s2102_s30 = scalar_lea.hbm %s2984_s0, %s1754_s27  ;;  %s139_s3 = scalar_lea.vmem [#allocation2], %s1666_s26 }
  0x18   : > { %s149_s4 = sshll.u32 %s139_s3, 4  ;;  %p2108_p0 = pnand %p1777_p13, %p2071_p4  ;;  %s2104_s4 = int_to_ptr.vmem [resolvable:$true] %s149_s4 }
  0x19   : > { %s136_s6 = scalar_lea.sflag [#allocation3], %s2095_s25  ;;  %s1846_s7 = scalar_lea.hbm %s2102_s30, 8192 }
  0x1a   : > { %p1847_p2 = scmp.ne.s32.totalorder %s2102_s30, %s1846_s7  ;;  %p1848_p3 = pneg %p2108_p0 }
  0x1b   : > { %s1851_s16 = scalar_lea.hbm %s2984_s0, 16384  ;;  %p1852_p4 = scmp.lt.u32.totalorder %s2102_s30, %s2984_s0 }
  0x1c   : > { %p1849_p5 = pnand %p1848_p3, %p1847_p2  ;;  %p1853_p7 = scmp.lt.u32.totalorder %s1851_s16, %s1846_s7 }
  0x1d   : > { %p1855_p13 = scmp.lt.u32.totalorder %s1846_s7, %s2102_s30 }
  0x1e   : > { %p1850_p6 = pneg %p1849_p5  ;;  %p1854_p10 = por %p1853_p7, %p1852_p4 }
  0x20   : > { %p1856_p12 = por %p1855_p13, %p1854_p10 }
  0x22   : > { %p1857_p1 = pnand %p1856_p12, %p1850_p6 }
  0x24   : > { %1860 = shalt.err (!%p1857_p1)
}
  0x25   : > { %s1861_s20 = scalar_lea.vmem %s2104_s4, 8192  ;;  %s2002_s26 = smov [#allocation2]  }
  0x26   : > { %p1862_p2 = scmp.ne.s32.totalorder %s2104_s4, %s1861_s20  ;;  %s1866_s27 = sshll.u32 %s2002_s26, 4  ;;  %s1867_s27 = int_to_ptr.vmem [resolvable:$false] %s1866_s27 }
  0x27   : > { %s1868_s28 = scalar_lea.vmem %s1867_s27, 16384  ;;  %p1869_p9 = scmp.lt.s32.totalorder %s2104_s4, %s1867_s27 }
  0x28   : > { %p1864_p5 = pnand %p1862_p2, %p1848_p3  ;;  %p1870_p4 = scmp.lt.s32.totalorder %s1868_s28, %s1861_s20 }
  0x2a   : > { %p1865_p11 = pneg %p1864_p5  ;;  %p1871_p7 = por %p1870_p4, %p1869_p9 }
  0x2c   : > { %p1872_p10 = pnand %p1871_p7, %p1865_p11 }
  0x2e   : > { %1875 = shalt.err (!%p1872_p10)
}
  0x2f   : > { %s2003_s29 = smov 128   ;;  %s2004_s3 = smov 8  }
  0x30   : > { %1769 = dma.hbm_to_vmem [thread:$0]  (!%p2108_p0), %s2102_s30, 8192, %s2104_s4, %s136_s6, %s2003_s29, %s2003_s29, %s2004_s3  }
  0x31   : > { %p180_p9 = scmp.lt.s32.totalorder %s1996_s14, 3  ;;  %s1755_s7 = smul.u32 704, %s2095_s25 }
  0x32   : > { %p2994_p11 = scmp.ge.s32.totalorder %s1996_s14, 1  ;;  %s1756_s15 = smul.u32 11264, %s1992_s13 }
  0x33   : > { %s163_s20 = scalar_lea.vmem [#allocation5], %s1755_s7  ;;  %s160_s30 = scalar_lea.sflag [#allocation6], %s2095_s25 }
  0x34   : > { %p2148_p12 = pnand %p2994_p11, %p180_p9  ;;  %s2156_s19 = scalar_lea.hbm %s2985_s1, %s1756_s15 }
  0x35   : > { %s172_s26 = sshll.u32 %s163_s20, 4  ;;  %s1876_s4 = scalar_lea.hbm %s2156_s19, 11264  ;;  %s2158_s26 = int_to_ptr.vmem [resolvable:$true] %s172_s26 }
  0x36   : > { %p1877_p1 = scmp.ne.s32.totalorder %s2156_s19, %s1876_s4  ;;  %s1881_s28 = scalar_lea.hbm %s2985_s1, 22528 }
  0x37   : > { %p1882_p2 = scmp.lt.u32.totalorder %s2156_s19, %s2985_s1  ;;  %p1883_p5 = scmp.lt.u32.totalorder %s1881_s28, %s1876_s4 }
  0x38   : > { %p1879_p6 = pnand %p1877_p1, %p1848_p3  ;;  %p1885_p7 = scmp.lt.u32.totalorder %s1876_s4, %s2156_s19 }
  0x39   : > { %p1884_p4 = por %p1883_p5, %p1882_p2 }
  0x3a   : > { %p1880_p13 = pneg %p1879_p6 }
  0x3b   : > { %p1886_p10 = por %p1885_p7, %p1884_p4 }
  0x3d   : > { %p1887_p9 = pnand %p1886_p10, %p1880_p13 }
  0x3f   : > { %1890 = shalt.err (!%p1887_p9)
}
  0x40   : > { %s1891_s7 = scalar_lea.vmem %s2158_s26, 11264  ;;  %s2005_s18 = smov [#allocation5]  }
  0x41   : > { %p1892_p11 = scmp.ne.s32.totalorder %s2158_s26, %s1891_s7  ;;  %s1896_s20 = sshll.u32 %s2005_s18, 4  ;;  %s1897_s20 = int_to_ptr.vmem [resolvable:$false] %s1896_s20 }
  0x42   : > { %s1898_s6 = scalar_lea.vmem %s1897_s20, 22528  ;;  %p1899_p8 = scmp.lt.s32.totalorder %s2158_s26, %s1897_s20 }
  0x43   : > { %p1894_p1 = pnand %p1892_p11, %p1848_p3  ;;  %p1900_p2 = scmp.lt.s32.totalorder %s1898_s6, %s1891_s7 }
  0x45   : > { %p1895_p6 = pneg %p1894_p1  ;;  %p1901_p5 = por %p1900_p2, %p1899_p8 }
  0x47   : > { %p1902_p4 = pnand %p1901_p5, %p1895_p6 }
  0x49   : > { %1905 = shalt.err (!%p1902_p4)
}
  0x4a   : > { %1772 = dma.hbm_to_vmem [thread:$0]  (!%p2108_p0), %s2156_s19, 11264, %s2158_s26, %s160_s30, %s2003_s29, %s2003_s29, %s2004_s3  }
  0x4b   : > { %184 = sbr.rel (%p2148_p12) target bundleno = 571 (0x23b), region = 28  ;;  %s2192_s4 = sand.u32 (!%p2148_p12), 1, %s1980_s10  }
  0x4c   : > { %s1671_s27 = sshll.u32 (!%p2148_p12), %s2192_s4, 9  ;;  %s187_s28 = scalar_lea.sflag (!%p2148_p12), [#allocation3], %s2192_s4 }
  0x4d   : > { %s2196_s5 = scalar_lea.vmem (!%p2148_p12), [#allocation2], %s1671_s27  ;;  %p2996_p8 = scmp.ne.s32.totalorder (!%p2148_p12), %s2990_s21, 0 }
  0x52   : > { %1963 = dma.done.wait (%p2996_p8), %s187_s28, 8192  }
  0x53   : > { %1965 = vsyncadd (%p2996_p8), %s187_s28, 4294959104  ;;  %s1757_s25 = smul.u32 704, %s2192_s4  ;;  %s196_s29 = scalar_lea.sflag [#allocation6], %s2192_s4 }
  0x55   : > { %s2204_s3 = scalar_lea.vmem [#allocation5], %s1757_s25 }
  0x56   : > { %1967 = dma.done.wait (%p2996_p8), %s196_s29, 11264  }
  0x57   : > { %1969 = vsyncadd (%p2996_p8), %s196_s29, 4294956032  ;;  %s1758_s8 = smul.u32 784, %s2192_s4  ;;  %s2213_s26 = smov 0  }
  0x59   : > { %s2211_s19 = scalar_lea.vmem [#allocation7], %s1758_s8 }
  0x5a LB: >> { %s1672_s30 = sshll.u32 %s2000_s26, 5  ;;  %s2006_s16 = smov 127   ;;  %s2000_s26 = sphi %s2213_s26, %s232_s26  }
  0x5b   : >> { %s2220_s15 = scalar_lea.vmem %s2204_s3, %s1672_s30 [#allocation5]  ;;  %s234_s21 = scalar_lea.vmem %s2196_s5, %s1672_s30 [#allocation2] }
  0x5c   : >> { %v2224_v0 = vld [vmem:[%s2220_s15 + $0x10] sm:$0xff]  ;;  %v2227_v2 = vld [vmem:[%s2220_s15] sm:$0xff]  ;;  %v2234_v4 = vld [vmem:[%s2220_s15 + $0x18] sm:$0xff]  ;;  %s2007_s7 = smov 126   ;;  %s2008_s18 = smov 125  }
  0x5d   : >> { %v237_v1 = vld [vmem:[%s234_s21 + $0x10] sm:$0xff]  ;;  %267 = vrot.lane.b32.xlu1 %v2224_v0, %s2006_s16  ;;  %263 = vrot.lane.b32.xlu0 %v2227_v2, %s2006_s16  ;;  %v235_v3 = vld [vmem:[%s234_s21] sm:$0xff]  ;;  %s2317_s20 = scalar_lea.vmem %s2211_s19, %s2000_s26 [#allocation7]  ;;  %s2009_s6 = smov 124  }
  0x5e   : >> { %v2236_v5 = vmul.f32 0.03125, %v235_v3  ;;  %v238_v6 = vld [vmem:[%s234_s21 + $0x18] sm:$0xff]  ;;  %v2239_v7 = vld [vmem:[%s2220_s15 + $0x8] sm:$0xff]  ;;  %v2241_v9 = vmul.f32 0.03125, %v237_v1  ;;  %v2246_v11 = vld [vmem:[%s2220_s15 + $0x20] sm:$0xff]  ;;  %s2010_s27 = smov 123  }
  0x5f   : >> { %v236_v8 = vld [vmem:[%s234_s21 + $0x8] sm:$0xff]  ;;  %v2250_v13 = vmul.f32 0.03125, %v238_v6  ;;  %v2258_v16 = vld [vmem:[%s2220_s15 + $0x30] sm:$0xff]  ;;  %v2274_v21 = vld [vmem:[%s2220_s15 + $0x40] sm:$0xff]  ;;  %s2011_s28 = smov 122   ;;  %s232_s26 = sadd.s32 1, %s2000_s26  }
  0x60   : >> { %v2243_v10 = vmul.f32 0.03125, %v236_v8  ;;  %v248_v12 = vmul.f32 %v2227_v2, %v2236_v5  ;;  %v2253_v14 = vld [vmem:[%s2220_s15 + $0x28] sm:$0xff]  ;;  %v414_v15 = vmul.f32 %v2246_v11, %v2236_v5  ;;  %v250_v17 = vmul.f32 %v2224_v0, %v2241_v9  ;;  %v2279_v23 = vld [vmem:[%s2220_s15 + $0x38] sm:$0xff]  ;;  %v2288_v27 = vld [vmem:[%s2220_s15 + $0x50] sm:$0xff]  ;;  %p229_p0 = scmp.ge.s32.totalorder %s232_s26, 16  }
  0x61   : >> { %269 = vrot.lane.b32.xlu1 %v2234_v4, %s2006_s16  ;;  %265 = vrot.lane.b32.xlu0 %v2239_v7, %s2006_s16  ;;  %v2271_v20 = vld [vmem:[%s2220_s15 + $0x48] sm:$0xff]  ;;  %v251_v22 = vmul.f32 %v2234_v4, %v2250_v13  ;;  %v416_v24 = vmul.f32 %v2258_v16, %v2241_v9  ;;  %v581_v26 = vmul.f32 %v2274_v21, %v2236_v5  ;;  %v2293_v31 = vld [vmem:[%s2220_s15 + $0x58] sm:$0xff]  ;;  %s1759_s25 = smul.u32 (%p229_p0), 12544, %s1988_s12  ;;  %s1425_s29 = sshll.u32 (%p229_p0), %s2211_s19, 4  ;;  %s2935_s29 = int_to_ptr.vmem [resolvable:$true] %s1425_s29 }
  0x62   : >> { %v249_v18 = vmul.f32 %v2239_v7, %v2243_v10  ;;  %v415_v19 = vmul.f32 %v2253_v14, %v2243_v10  ;;  %v582_v25 = vmul.f32 %v2271_v20, %v2243_v10  ;;  %v417_v30 = vmul.f32 %v2279_v23, %v2250_v13  ;;  %v2331_v59 = vld [vmem:[%s2220_s15 + $0x68] sm:$0xff]  ;;  %v2338_v60 = vld [vmem:[%s2220_s15 + $0x60] sm:$0xff]  ;;  %v2341_v61 = vld [vmem:[%s2220_s15 + $0x70] sm:$0xff]  ;;  %s1410_s21 = scalar_lea.sflag (%p229_p0), [#allocation4], %s2192_s4  ;;  %p2997_p12 = scmp.ne.s32.totalorder (%p229_p0), %s2991_s22, 0 }
  0x63   : >> { %v583_v32 = vmul.f32 %v2288_v27, %v2241_v9  ;;  %v584_v34 = vmul.f32 %v2293_v31, %v2250_v13  ;;  %v749_v62 = vmul.f32 %v2331_v59, %v2243_v10  ;;  %v748_v63 = vmul.f32 %v2338_v60, %v2236_v5  ;;  %v2350_v3 = vld [vmem:[%s2220_s15 + $0x78] sm:$0xff]  ;;  %s2012_s5 = smov (%p229_p0), [#allocation7]  }
  0x64   : >> { %v252_v28 = vadd.f32 %v249_v18, %v248_v12  ;;  %v418_v29 = vadd.f32 %v415_v19, %v414_v15  ;;  %v585_v33 = vadd.f32 %v582_v25, %v581_v26  ;;  %v750_v1 = vmul.f32 %v2341_v61, %v2241_v9  ;;  %s1910_s3 = sshll.u32 (%p229_p0), %s2012_s5, 4  ;;  %s1911_s3 = int_to_ptr.vmem [resolvable:$false] %s1910_s3 }
  0x65   : >> { %289 = vrot.lane.b32.xlu1 %v2239_v7, %s2007_s7  ;;  %287 = vrot.lane.b32.xlu0 %v2227_v2, %s2007_s7  ;;  %v752_v6 = vadd.f32 %v749_v62, %v748_v63  ;;  %v751_v8 = vmul.f32 %v2350_v3, %v2250_v13  ;;  %v2484_v62 = vld [vmem:[%s2220_s15 + $0xa0] sm:$0xff]  ;;  %s1912_s12 = scalar_lea.vmem (%p229_p0), %s1911_s3, 25088  ;;  %p1913_p10 = scmp.lt.s32.totalorder (%p229_p0), %s2935_s29, %s1911_s3 }
  0x66   : >> { %v253_v35 = vadd.f32 %v252_v28, %v250_v17  ;;  %v419_v36 = vadd.f32 %v418_v29, %v416_v24  ;;  %v586_v37 = vadd.f32 %v585_v33, %v583_v32  ;;  %v2419_v29 = vld [vmem:[%s2220_s15 + $0x98] sm:$0xff] }
  0x67   : >> { %v753_v12 = vadd.f32 %v752_v6, %v750_v1  ;;  %v918_v32 = vmul.f32 %v2419_v29, %v2250_v13 }
  0x68   : >> { %v254_v38 = vadd.f32 %v253_v35, %v251_v22  ;;  %v420_v39 = vadd.f32 %v419_v36, %v417_v30  ;;  %v587_v40 = vadd.f32 %v586_v37, %v584_v34 }
  0x69   : >> { %293 = vrot.lane.b32.xlu1 %v2234_v4, %s2007_s7  ;;  %291 = vrot.lane.b32.xlu0 %v2224_v0, %s2007_s7  ;;  %v754_v15 = vadd.f32 %v753_v12, %v751_v8  ;;  %v1082_v8 = vmul.f32 %v2484_v62, %v2236_v5  ;;  %v2491_v12 = vld [vmem:[%s2220_s15 + $0xb0] sm:$0xff] }
  0x6a   : >> { %v255_v41 = vrot.slane %v254_v38, 4  ;;  %v421_v42 = vrot.slane %v420_v39, 4  ;;  %v588_v43 = vrot.slane %v587_v40, 4 }
  0x6b   : >> { %v755_v17 = vrot.slane %v754_v15, 4 }
  0x6c   : >> { %v256_v44 = vadd.f32 %v255_v41, %v254_v38  ;;  %v422_v45 = vadd.f32 %v421_v42, %v420_v39  ;;  %v589_v46 = vadd.f32 %v588_v43, %v587_v40 }
  0x6d   : >> { %313 = vrot.lane.b32.xlu1 %v2239_v7, %s2008_s18  ;;  %311 = vrot.lane.b32.xlu0 %v2227_v2, %s2008_s18  ;;  %v756_v18 = vadd.f32 %v755_v17, %v754_v15 }
  0x6e   : >> { %v257_v47 = vrot.slane %v256_v44, 2  ;;  %v423_v48 = vrot.slane %v422_v45, 2  ;;  %v590_v49 = vrot.slane %v589_v46, 2 }
  0x6f   : >> { %v757_v19 = vrot.slane %v756_v18, 2 }
  0x70   : >> { %v258_v50 = vadd.f32 %v257_v47, %v256_v44  ;;  %v424_v51 = vadd.f32 %v423_v48, %v422_v45  ;;  %v591_v52 = vadd.f32 %v590_v49, %v589_v46 }
  0x71   : >> { %317 = vrot.lane.b32.xlu1 %v2234_v4, %s2008_s18  ;;  %315 = vrot.lane.b32.xlu0 %v2224_v0, %s2008_s18  ;;  %v758_v22 = vadd.f32 %v757_v19, %v756_v18  ;;  %v1084_v18 = vmul.f32 %v2491_v12, %v2241_v9 }
  0x72   : >> { %v259_v53 = vrot.slane %v258_v50, 1  ;;  %v425_v54 = vrot.slane %v424_v51, 1  ;;  %v592_v55 = vrot.slane %v591_v52, 1 }
  0x74   : >> { %v260_v56 = vadd.f32 %v259_v53, %v258_v50  ;;  %v426_v57 = vadd.f32 %v425_v54, %v424_v51  ;;  %v593_v58 = vadd.f32 %v592_v55, %v591_v52 }
  0x75   : >> { %337 = vrot.lane.b32.xlu1 %v2239_v7, %s2009_s6  ;;  %335 = vrot.lane.b32.xlu0 %v2227_v2, %s2009_s6 }
  0x76   : >> { %262 = vst [vmem:[%s2317_s20] sm:$0x1] %v260_v56  ;;  %1684 = vst [vmem:[%s2317_s20 + $0x70] sm:$0x1] %v426_v57 }
  0x77   : >> { %1696 = vst [vmem:[%s2317_s20 + $0xe0] sm:$0x1] %v593_v58  ;;  %v2481_v58 = vld [vmem:[%s2220_s15 + $0xa8] sm:$0xff] }
  0x78   : >> { %v1083_v6 = vmul.f32 %v2481_v58, %v2243_v10 }
  0x79   : >> { %341 = vrot.lane.b32.xlu1 %v2234_v4, %s2009_s6  ;;  %339 = vrot.lane.b32.xlu0 %v2224_v0, %s2009_s6 }
  0x7d   : >> { %361 = vrot.lane.b32.xlu1 %v2239_v7, %s2010_s27  ;;  %359 = vrot.lane.b32.xlu0 %v2227_v2, %s2010_s27 }
  0x81   : >> { %365 = vrot.lane.b32.xlu1 %v2234_v4, %s2010_s27  ;;  %363 = vrot.lane.b32.xlu0 %v2224_v0, %s2010_s27 }
  0x85   : >> { %385 = vrot.lane.b32.xlu1 %v2239_v7, %s2011_s28  ;;  %383 = vrot.lane.b32.xlu0 %v2227_v2, %s2011_s28  ;;  %v759_v7 = vrot.slane %v758_v22, 1  ;;  %v2407_v2 = vld [vmem:[%s2220_s15 + $0x80] sm:$0xff] }
  0x86   : >> { %v915_v26 = vmul.f32 %v2407_v2, %v2236_v5 }
  0x87   : >> { %v760_v24 = vadd.f32 %v759_v7, %v758_v22 }
  0x89   : >> { %389 = vrot.lane.b32.xlu1 %v2234_v4, %s2011_s28  ;;  %387 = vrot.lane.b32.xlu0 %v2224_v0, %s2011_s28  ;;  %1708 = vst [vmem:[%s2317_s20 + $0x150] sm:$0x1] %v760_v24  ;;  %v2400_v0 = vld [vmem:[%s2220_s15 + $0x88] sm:$0xff] }
  0x8a   : >> { %v2410_v4 = vld [vmem:[%s2220_s15 + $0x90] sm:$0xff]  ;;  %v916_v25 = vmul.f32 %v2400_v0, %v2243_v10 }
  0x8b   : >> { %v917_v28 = vmul.f32 %v2410_v4, %v2241_v9 }
  0x8c   : >> { %v919_v30 = vadd.f32 %v916_v25, %v915_v26  ;;  %v2498_v25 = vld [vmem:[%s2220_s15 + $0xb8] sm:$0xff]  ;;  %v1086_v26 = vadd.f32 %v1083_v6, %v1082_v8 }
  0x8d   : >> { %432 = vrot.lane.b32.xlu1 %v2253_v14, %s2006_s16  ;;  %430 = vrot.lane.b32.xlu0 %v2246_v11, %s2006_s16 }
  0x8e   : >> { %v920_v33 = vadd.f32 %v919_v30, %v917_v28  ;;  %v1085_v28 = vmul.f32 %v2498_v25, %v2250_v13 }
  0x90   : >> { %v921_v34 = vadd.f32 %v920_v33, %v918_v32 }
  0x91   : >> { %436 = vrot.lane.b32.xlu1 %v2279_v23, %s2006_s16  ;;  %434 = vrot.lane.b32.xlu0 %v2258_v16, %s2006_s16 }
  0x92   : >> { %v922_v35 = vrot.slane %v921_v34, 4 }
  0x94   : >> { %v923_v36 = vadd.f32 %v922_v35, %v921_v34  ;;  %v1087_v35 = vadd.f32 %v1086_v26, %v1084_v18 }
  0x95   : >> { %456 = vrot.lane.b32.xlu1 %v2253_v14, %s2007_s7  ;;  %454 = vrot.lane.b32.xlu0 %v2246_v11, %s2007_s7 }
  0x96   : >> { %v924_v37 = vrot.slane %v923_v36, 2 }
  0x98   : >> { %v925_v38 = vadd.f32 %v924_v37, %v923_v36 }
  0x99   : >> { %460 = vrot.lane.b32.xlu1 %v2279_v23, %s2007_s7  ;;  %458 = vrot.lane.b32.xlu0 %v2258_v16, %s2007_s7 }
  0x9d   : >> { %480 = vrot.lane.b32.xlu1 %v2253_v14, %s2008_s18  ;;  %478 = vrot.lane.b32.xlu0 %v2246_v11, %s2008_s18 }
  0xa1   : >> { %484 = vrot.lane.b32.xlu1 %v2279_v23, %s2008_s18  ;;  %482 = vrot.lane.b32.xlu0 %v2258_v16, %s2008_s18 }
  0xa5   : >> { %504 = vrot.lane.b32.xlu1 %v2253_v14, %s2009_s6  ;;  %502 = vrot.lane.b32.xlu0 %v2246_v11, %s2009_s6 }
  0xa9   : >> { %508 = vrot.lane.b32.xlu1 %v2279_v23, %s2009_s6  ;;  %506 = vrot.lane.b32.xlu0 %v2258_v16, %s2009_s6 }
  0xad   : >> { %528 = vrot.lane.b32.xlu1 %v2253_v14, %s2010_s27  ;;  %526 = vrot.lane.b32.xlu0 %v2246_v11, %s2010_s27 }
  0xb1   : >> { %532 = vrot.lane.b32.xlu1 %v2279_v23, %s2010_s27  ;;  %530 = vrot.lane.b32.xlu0 %v2258_v16, %s2010_s27 }
  0xb5   : >> { %552 = vrot.lane.b32.xlu1 %v2253_v14, %s2011_s28  ;;  %550 = vrot.lane.b32.xlu0 %v2246_v11, %s2011_s28  ;;  %v926_v14 = vrot.slane %v925_v38, 1 }
  0xb7   : >> { %v927_v39 = vadd.f32 %v926_v14, %v925_v38 }
  0xb9   : >> { %556 = vrot.lane.b32.xlu1 %v2279_v23, %s2011_s28  ;;  %554 = vrot.lane.b32.xlu0 %v2258_v16, %s2011_s28  ;;  %1720 = vst [vmem:[%s2317_s20 + $0x1c0] sm:$0x1] %v927_v39  ;;  %v1088_v39 = vadd.f32 %v1087_v35, %v1085_v28 }
  0xbd   : >> { %599 = vrot.lane.b32.xlu1 %v2271_v20, %s2006_s16  ;;  %597 = vrot.lane.b32.xlu0 %v2274_v21, %s2006_s16 }
  0xc1   : >> { %603 = vrot.lane.b32.xlu1 %v2293_v31, %s2006_s16  ;;  %601 = vrot.lane.b32.xlu0 %v2288_v27, %s2006_s16 }
  0xc5   : >> { %623 = vrot.lane.b32.xlu1 %v2271_v20, %s2007_s7  ;;  %621 = vrot.lane.b32.xlu0 %v2274_v21, %s2007_s7 }
  0xc9   : >> { %627 = vrot.lane.b32.xlu1 %v2293_v31, %s2007_s7  ;;  %625 = vrot.lane.b32.xlu0 %v2288_v27, %s2007_s7 }
  0xcd   : >> { %647 = vrot.lane.b32.xlu1 %v2271_v20, %s2008_s18  ;;  %645 = vrot.lane.b32.xlu0 %v2274_v21, %s2008_s18 }
  0xcf   : >> { %v268_v11 = vpop.permute.xlu1 %267  ;;  %v264_v16 = vpop.permute.xlu0 %263 }
  0xd0   : >> { %v271_v41 = vmul.f32 %v264_v16, %v2236_v5  ;;  %v273_v43 = vmul.f32 %v268_v11, %v2241_v9 }
  0xd1   : >> { %651 = vrot.lane.b32.xlu1 %v2293_v31, %s2008_s18  ;;  %649 = vrot.lane.b32.xlu0 %v2288_v27, %s2008_s18 }
  0xd3   : >> { %v270_v23 = vpop.permute.xlu1 %269  ;;  %v266_v40 = vpop.permute.xlu0 %265 }
  0xd4   : >> { %v272_v42 = vmul.f32 %v266_v40, %v2243_v10  ;;  %v274_v47 = vmul.f32 %v270_v23, %v2250_v13 }
  0xd5   : >> { %671 = vrot.lane.b32.xlu1 %v2271_v20, %s2009_s6  ;;  %669 = vrot.lane.b32.xlu0 %v2274_v21, %s2009_s6 }
  0xd6   : >> { %v275_v44 = vadd.f32 %v272_v42, %v271_v41 }
  0xd7   : >> { %v290_v45 = vpop.permute.xlu1 %289  ;;  %v288_v46 = vpop.permute.xlu0 %287 }
  0xd8   : >> { %v276_v48 = vadd.f32 %v275_v44, %v273_v43  ;;  %v296_v49 = vmul.f32 %v290_v45, %v2243_v10  ;;  %v295_v50 = vmul.f32 %v288_v46, %v2236_v5  ;;  %v1089_v43 = vrot.slane %v1088_v39, 4 }
  0xd9   : >> { %675 = vrot.lane.b32.xlu1 %v2293_v31, %s2009_s6  ;;  %673 = vrot.lane.b32.xlu0 %v2288_v27, %s2009_s6 }
  0xda   : >> { %v277_v51 = vadd.f32 %v276_v48, %v274_v47  ;;  %v299_v55 = vadd.f32 %v296_v49, %v295_v50 }
  0xdb   : >> { %v294_v52 = vpop.permute.xlu1 %293  ;;  %v292_v53 = vpop.permute.xlu0 %291 }
  0xdc   : >> { %v278_v54 = vrot.slane %v277_v51, 4  ;;  %v297_v56 = vmul.f32 %v292_v53, %v2241_v9  ;;  %v298_v57 = vmul.f32 %v294_v52, %v2250_v13 }
  0xdd   : >> { %695 = vrot.lane.b32.xlu1 %v2271_v20, %s2010_s27  ;;  %693 = vrot.lane.b32.xlu0 %v2274_v21, %s2010_s27 }
  0xde   : >> { %v279_v63 = vadd.f32 %v278_v54, %v277_v51  ;;  %v300_v1 = vadd.f32 %v299_v55, %v297_v56 }
  0xdf   : >> { %v314_v15 = vpop.permute.xlu1 %313  ;;  %v312_v17 = vpop.permute.xlu0 %311 }
  0xe0   : >> { %v280_v19 = vrot.slane %v279_v63, 2  ;;  %v301_v22 = vadd.f32 %v300_v1, %v298_v57  ;;  %v320_v7 = vmul.f32 %v314_v15, %v2243_v10  ;;  %v319_v24 = vmul.f32 %v312_v17, %v2236_v5 }
  0xe1   : >> { %699 = vrot.lane.b32.xlu1 %v2293_v31, %s2010_s27  ;;  %697 = vrot.lane.b32.xlu0 %v2288_v27, %s2010_s27 }
  0xe2   : >> { %v281_v30 = vadd.f32 %v280_v19, %v279_v63  ;;  %v302_v32 = vrot.slane %v301_v22, 4  ;;  %v323_v38 = vadd.f32 %v320_v7, %v319_v24 }
  0xe3   : >> { %v318_v33 = vpop.permute.xlu1 %317  ;;  %v316_v34 = vpop.permute.xlu0 %315 }
  0xe4   : >> { %v282_v36 = vrot.slane %v281_v30, 1  ;;  %v303_v37 = vadd.f32 %v302_v32, %v301_v22  ;;  %v321_v14 = vmul.f32 %v316_v34, %v2241_v9  ;;  %v322_v23 = vmul.f32 %v318_v33, %v2250_v13 }
  0xe5   : >> { %719 = vrot.lane.b32.xlu1 %v2271_v20, %s2011_s28  ;;  %717 = vrot.lane.b32.xlu0 %v2274_v21, %s2011_s28  ;;  %v1090_v20 = vadd.f32 %v1089_v43, %v1088_v39 }
  0xe6   : >> { %v283_v11 = vadd.f32 %v282_v36, %v281_v30  ;;  %v304_v16 = vrot.slane %v303_v37, 2  ;;  %v324_v40 = vadd.f32 %v323_v38, %v321_v14 }
  0xe7   : >> { %v338_v41 = vpop.permute.xlu1 %337  ;;  %v336_v42 = vpop.permute.xlu0 %335  ;;  %v1091_v51 = vrot.slane %v1090_v20, 2 }
  0xe8   : >> { %1673 = vst [vmem:[%s2317_s20 + $0x10] sm:$0x1] %v283_v11  ;;  %v305_v44 = vadd.f32 %v304_v16, %v303_v37  ;;  %v325_v45 = vadd.f32 %v324_v40, %v322_v23  ;;  %v344_v46 = vmul.f32 %v338_v41, %v2243_v10  ;;  %v343_v47 = vmul.f32 %v336_v42, %v2236_v5 }
  0xe9   : >> { %723 = vrot.lane.b32.xlu1 %v2293_v31, %s2011_s28  ;;  %721 = vrot.lane.b32.xlu0 %v2288_v27, %s2011_s28  ;;  %v1092_v31 = vadd.f32 %v1091_v51, %v1090_v20 }
  0xea   : >> { %v306_v21 = vrot.slane %v305_v44, 1  ;;  %v326_v48 = vrot.slane %v325_v45, 4  ;;  %v347_v54 = vadd.f32 %v344_v46, %v343_v47 }
  0xeb   : >> { %v342_v49 = vpop.permute.xlu1 %341  ;;  %v340_v50 = vpop.permute.xlu0 %339  ;;  %v1093_v6 = vrot.slane %v1092_v31, 1 }
  0xec   : >> { %v307_v52 = vadd.f32 %v306_v21, %v305_v44  ;;  %v327_v53 = vadd.f32 %v326_v48, %v325_v45  ;;  %v345_v55 = vmul.f32 %v340_v50, %v2241_v9  ;;  %v346_v56 = vmul.f32 %v342_v49, %v2250_v13 }
  0xed   : >> { %766 = vrot.lane.b32.xlu1 %v2331_v59, %s2006_s16  ;;  %764 = vrot.lane.b32.xlu0 %v2338_v60, %s2006_s16  ;;  %v1094_v19 = vadd.f32 %v1093_v6, %v1092_v31 }
  0xee   : >> { %1674 = vst [vmem:[%s2317_s20 + $0x20] sm:$0x1] %v307_v52  ;;  %v328_v27 = vrot.slane %v327_v53, 2  ;;  %v348_v57 = vadd.f32 %v347_v54, %v345_v55 }
  0xef   : >> { %v362_v63 = vpop.permute.xlu1 %361  ;;  %v360_v1 = vpop.permute.xlu0 %359  ;;  %1732 = vst [vmem:[%s2317_s20 + $0x230] sm:$0x1] %v1094_v19 }
  0xf0   : >> { %v329_v8 = vadd.f32 %v328_v27, %v327_v53  ;;  %v349_v15 = vadd.f32 %v348_v57, %v346_v56  ;;  %v368_v17 = vmul.f32 %v362_v63, %v2243_v10  ;;  %v367_v18 = vmul.f32 %v360_v1, %v2236_v5 }
  0xf1   : >> { %770 = vrot.lane.b32.xlu1 %v2350_v3, %s2006_s16  ;;  %768 = vrot.lane.b32.xlu0 %v2341_v61, %s2006_s16 }
  0xf2   : >> { %v330_v22 = vrot.slane %v329_v8, 1  ;;  %v350_v7 = vrot.slane %v349_v15, 4  ;;  %v371_v32 = vadd.f32 %v368_v17, %v367_v18 }
  0xf3   : >> { %v366_v24 = vpop.permute.xlu1 %365  ;;  %v364_v26 = vpop.permute.xlu0 %363 }
  0xf4   : >> { %v331_v28 = vadd.f32 %v330_v22, %v329_v8  ;;  %v351_v30 = vadd.f32 %v350_v7, %v349_v15  ;;  %v369_v33 = vmul.f32 %v364_v26, %v2241_v9  ;;  %v370_v35 = vmul.f32 %v366_v24, %v2250_v13 }
  0xf5   : >> { %790 = vrot.lane.b32.xlu1 %v2331_v59, %s2007_s7  ;;  %788 = vrot.lane.b32.xlu0 %v2338_v60, %s2007_s7 }
  0xf6   : >> { %1675 = vst [vmem:[%s2317_s20 + $0x30] sm:$0x1] %v331_v28  ;;  %v352_v34 = vrot.slane %v351_v30, 2  ;;  %v372_v36 = vadd.f32 %v371_v32, %v369_v33 }
  0xf7   : >> { %v386_v37 = vpop.permute.xlu1 %385  ;;  %v384_v38 = vpop.permute.xlu0 %383 }
  0xf8   : >> { %v353_v14 = vadd.f32 %v352_v34, %v351_v30  ;;  %v373_v39 = vadd.f32 %v372_v36, %v370_v35  ;;  %v392_v11 = vmul.f32 %v386_v37, %v2243_v10  ;;  %v391_v16 = vmul.f32 %v384_v38, %v2236_v5 }
  0xf9   : >> { %794 = vrot.lane.b32.xlu1 %v2350_v3, %s2007_s7  ;;  %792 = vrot.lane.b32.xlu0 %v2341_v61, %s2007_s7 }
  0xfa   : >> { %v354_v23 = vrot.slane %v353_v14, 1  ;;  %v374_v40 = vrot.slane %v373_v39, 4  ;;  %v395_v45 = vadd.f32 %v392_v11, %v391_v16 }
  0xfb   : >> { %v390_v41 = vpop.permute.xlu1 %389  ;;  %v388_v42 = vpop.permute.xlu0 %387 }
  0xfc   : >> { %v355_v43 = vadd.f32 %v354_v23, %v353_v14  ;;  %v375_v44 = vadd.f32 %v374_v40, %v373_v39  ;;  %v393_v46 = vmul.f32 %v388_v42, %v2241_v9  ;;  %v394_v20 = vmul.f32 %v390_v41, %v2250_v13 }
  0xfd   : >> { %814 = vrot.lane.b32.xlu1 %v2331_v59, %s2008_s18  ;;  %812 = vrot.lane.b32.xlu0 %v2338_v60, %s2008_s18 }
  0xfe   : >> { %1676 = vst [vmem:[%s2317_s20 + $0x40] sm:$0x1] %v355_v43  ;;  %v376_v47 = vrot.slane %v375_v44, 2  ;;  %v396_v21 = vadd.f32 %v395_v45, %v393_v46 }
  0xff   : >> { %v433_v48 = vpop.permute.xlu1 %432  ;;  %v431_v49 = vpop.permute.xlu0 %430 }
 0x100   : >> { %v377_v50 = vadd.f32 %v376_v47, %v375_v44  ;;  %v397_v51 = vadd.f32 %v396_v21, %v394_v20  ;;  %v439_v52 = vmul.f32 %v433_v48, %v2243_v10  ;;  %v438_v53 = vmul.f32 %v431_v49, %v2236_v5 }
 0x101   : >> { %818 = vrot.lane.b32.xlu1 %v2350_v3, %s2008_s18  ;;  %816 = vrot.lane.b32.xlu0 %v2341_v61, %s2008_s18 }
 0x102   : >> { %v378_v54 = vrot.slane %v377_v50, 1  ;;  %v398_v55 = vrot.slane %v397_v51, 4  ;;  %v442_v63 = vadd.f32 %v439_v52, %v438_v53 }
 0x103   : >> { %v437_v31 = vpop.permute.xlu1 %436  ;;  %v435_v27 = vpop.permute.xlu0 %434 }
 0x104   : >> { %v379_v56 = vadd.f32 %v378_v54, %v377_v50  ;;  %v399_v57 = vadd.f32 %v398_v55, %v397_v51  ;;  %v440_v1 = vmul.f32 %v435_v27, %v2241_v9  ;;  %v441_v8 = vmul.f32 %v437_v31, %v2250_v13 }
 0x105   : >> { %838 = vrot.lane.b32.xlu1 %v2331_v59, %s2009_s6  ;;  %836 = vrot.lane.b32.xlu0 %v2338_v60, %s2009_s6 }
 0x106   : >> { %1677 = vst [vmem:[%s2317_s20 + $0x50] sm:$0x1] %v379_v56  ;;  %v400_v6 = vrot.slane %v399_v57, 2  ;;  %v443_v15 = vadd.f32 %v442_v63, %v440_v1 }
 0x107   : >> { %v457_v17 = vpop.permute.xlu1 %456  ;;  %v455_v18 = vpop.permute.xlu0 %454 }
 0x108   : >> { %v401_v19 = vadd.f32 %v400_v6, %v399_v57  ;;  %v444_v22 = vadd.f32 %v443_v15, %v441_v8  ;;  %v463_v7 = vmul.f32 %v457_v17, %v2243_v10  ;;  %v462_v24 = vmul.f32 %v455_v18, %v2236_v5 }
 0x109   : >> { %842 = vrot.lane.b32.xlu1 %v2350_v3, %s2009_s6  ;;  %840 = vrot.lane.b32.xlu0 %v2341_v61, %s2009_s6 }
 0x10a   : >> { %v402_v26 = vrot.slane %v401_v19, 1  ;;  %v445_v28 = vrot.slane %v444_v22, 4  ;;  %v466_v35 = vadd.f32 %v463_v7, %v462_v24 }
 0x10b   : >> { %v461_v30 = vpop.permute.xlu1 %460  ;;  %v459_v32 = vpop.permute.xlu0 %458 }
 0x10c   : >> { %v403_v33 = vadd.f32 %v402_v26, %v401_v19  ;;  %v446_v34 = vadd.f32 %v445_v28, %v444_v22  ;;  %v464_v36 = vmul.f32 %v459_v32, %v2241_v9  ;;  %v465_v38 = vmul.f32 %v461_v30, %v2250_v13 }
 0x10d   : >> { %862 = vrot.lane.b32.xlu1 %v2331_v59, %s2010_s27  ;;  %860 = vrot.lane.b32.xlu0 %v2338_v60, %s2010_s27 }
 0x10e   : >> { %1678 = vst [vmem:[%s2317_s20 + $0x60] sm:$0x1] %v403_v33  ;;  %v447_v37 = vrot.slane %v446_v34, 2  ;;  %v467_v14 = vadd.f32 %v466_v35, %v464_v36  ;;  %v2613_v36 = vld [vmem:[%s2220_s15 + $0xc8] sm:$0xff] }
 0x10f   : >> { %v481_v39 = vpop.permute.xlu1 %480  ;;  %v479_v11 = vpop.permute.xlu0 %478 }
 0x110   : >> { %v448_v16 = vadd.f32 %v447_v37, %v446_v34  ;;  %v468_v23 = vadd.f32 %v467_v14, %v465_v38  ;;  %v487_v40 = vmul.f32 %v481_v39, %v2243_v10  ;;  %v486_v41 = vmul.f32 %v479_v11, %v2236_v5  ;;  %v2616_v37 = vld [vmem:[%s2220_s15 + $0xc0] sm:$0xff] }
 0x111   : >> { %866 = vrot.lane.b32.xlu1 %v2350_v3, %s2010_s27  ;;  %864 = vrot.lane.b32.xlu0 %v2341_v61, %s2010_s27  ;;  %v1250_v38 = vmul.f32 %v2613_v36, %v2243_v10  ;;  %v1249_v14 = vmul.f32 %v2616_v37, %v2236_v5 }
 0x112   : >> { %v449_v42 = vrot.slane %v448_v16, 1  ;;  %v469_v43 = vrot.slane %v468_v23, 4  ;;  %v490_v20 = vadd.f32 %v487_v40, %v486_v41 }
 0x113   : >> { %v485_v44 = vpop.permute.xlu1 %484  ;;  %v483_v45 = vpop.permute.xlu0 %482 }
 0x114   : >> { %v450_v46 = vadd.f32 %v449_v42, %v448_v16  ;;  %v470_v47 = vadd.f32 %v469_v43, %v468_v23  ;;  %v488_v21 = vmul.f32 %v483_v45, %v2241_v9  ;;  %v489_v49 = vmul.f32 %v485_v44, %v2250_v13  ;;  %v2631_v45 = vld [vmem:[%s2220_s15 + $0xd0] sm:$0xff] }
 0x115   : >> { %886 = vrot.lane.b32.xlu1 %v2331_v59, %s2011_s28  ;;  %884 = vrot.lane.b32.xlu0 %v2338_v60, %s2011_s28 }
 0x116   : >> { %1685 = vst [vmem:[%s2317_s20 + $0x80] sm:$0x1] %v450_v46  ;;  %v471_v48 = vrot.slane %v470_v47, 2  ;;  %v491_v50 = vadd.f32 %v490_v20, %v488_v21  ;;  %v1253_v46 = vadd.f32 %v1250_v38, %v1249_v14 }
 0x117   : >> { %v505_v51 = vpop.permute.xlu1 %504  ;;  %v503_v52 = vpop.permute.xlu0 %502 }
 0x118   : >> { %v472_v53 = vadd.f32 %v471_v48, %v470_v47  ;;  %v492_v54 = vadd.f32 %v491_v50, %v489_v49  ;;  %v511_v55 = vmul.f32 %v505_v51, %v2243_v10  ;;  %v510_v31 = vmul.f32 %v503_v52, %v2236_v5 }
 0x119   : >> { %890 = vrot.lane.b32.xlu1 %v2350_v3, %s2011_s28  ;;  %888 = vrot.lane.b32.xlu0 %v2341_v61, %s2011_s28  ;;  %v1251_v47 = vmul.f32 %v2631_v45, %v2241_v9 }
 0x11a   : >> { %v473_v59 = vrot.slane %v472_v53, 1  ;;  %v493_v60 = vrot.slane %v492_v54, 4  ;;  %v514_v1 = vadd.f32 %v511_v55, %v510_v31  ;;  %v2645_v55 = vld [vmem:[%s2220_s15 + $0xd8] sm:$0xff] }
 0x11b   : >> { %v509_v27 = vpop.permute.xlu1 %508  ;;  %v507_v56 = vpop.permute.xlu0 %506 }
 0x11c   : >> { %v474_v57 = vadd.f32 %v473_v59, %v472_v53  ;;  %v494_v63 = vadd.f32 %v493_v60, %v492_v54  ;;  %v512_v6 = vmul.f32 %v507_v56, %v2241_v9  ;;  %v513_v8 = vmul.f32 %v509_v27, %v2250_v13 }
 0x11d   : >> { %933 = vrot.lane.b32.xlu1 %v2400_v0, %s2006_s16  ;;  %931 = vrot.lane.b32.xlu0 %v2407_v2, %s2006_s16  ;;  %v1254_v54 = vadd.f32 %v1253_v46, %v1251_v47  ;;  %v1252_v27 = vmul.f32 %v2645_v55, %v2250_v13 }
 0x11e   : >> { %1686 = vst [vmem:[%s2317_s20 + $0x90] sm:$0x1] %v474_v57  ;;  %v495_v3 = vrot.slane %v494_v63, 2  ;;  %v515_v61 = vadd.f32 %v514_v1, %v512_v6 }
 0x11f   : >> { %v529_v15 = vpop.permute.xlu1 %528  ;;  %v527_v17 = vpop.permute.xlu0 %526 }
 0x120   : >> { %v496_v18 = vadd.f32 %v495_v3, %v494_v63  ;;  %v516_v19 = vadd.f32 %v515_v61, %v513_v8  ;;  %v535_v22 = vmul.f32 %v529_v15, %v2243_v10  ;;  %v534_v7 = vmul.f32 %v527_v17, %v2236_v5 }
 0x121   : >> { %937 = vrot.lane.b32.xlu1 %v2419_v29, %s2006_s16  ;;  %935 = vrot.lane.b32.xlu0 %v2410_v4, %s2006_s16  ;;  %v1255_v8 = vadd.f32 %v1254_v54, %v1252_v27 }
 0x122   : >> { %v497_v24 = vrot.slane %v496_v18, 1  ;;  %v517_v26 = vrot.slane %v516_v19, 4  ;;  %v538_v34 = vadd.f32 %v535_v22, %v534_v7 }
 0x123   : >> { %v533_v28 = vpop.permute.xlu1 %532  ;;  %v531_v30 = vpop.permute.xlu0 %530 }
 0x124   : >> { %v498_v32 = vadd.f32 %v497_v24, %v496_v18  ;;  %v518_v33 = vadd.f32 %v517_v26, %v516_v19  ;;  %v536_v35 = vmul.f32 %v531_v30, %v2241_v9  ;;  %v537_v11 = vmul.f32 %v533_v28, %v2250_v13 }
 0x125   : >> { %957 = vrot.lane.b32.xlu1 %v2400_v0, %s2007_s7  ;;  %955 = vrot.lane.b32.xlu0 %v2407_v2, %s2007_s7  ;;  %v1256_v19 = vrot.slane %v1255_v8, 4 }
 0x126   : >> { %1687 = vst [vmem:[%s2317_s20 + $0xa0] sm:$0x1] %v498_v32  ;;  %v519_v39 = vrot.slane %v518_v33, 2  ;;  %v539_v16 = vadd.f32 %v538_v34, %v536_v35 }
 0x127   : >> { %v553_v23 = vpop.permute.xlu1 %552  ;;  %v551_v40 = vpop.permute.xlu0 %550  ;;  %v1257_v28 = vadd.f32 %v1256_v19, %v1255_v8 }
 0x128   : >> { %v520_v41 = vadd.f32 %v519_v39, %v518_v33  ;;  %v540_v42 = vadd.f32 %v539_v16, %v537_v11  ;;  %v559_v43 = vmul.f32 %v553_v23, %v2243_v10  ;;  %v558_v44 = vmul.f32 %v551_v40, %v2236_v5 }
 0x129   : >> { %961 = vrot.lane.b32.xlu1 %v2419_v29, %s2007_s7  ;;  %959 = vrot.lane.b32.xlu0 %v2410_v4, %s2007_s7  ;;  %v1258_v38 = vrot.slane %v1257_v28, 2 }
 0x12a   : >> { %v521_v20 = vrot.slane %v520_v41, 1  ;;  %v541_v21 = vrot.slane %v540_v42, 4  ;;  %v562_v52 = vadd.f32 %v559_v43, %v558_v44 }
 0x12b   : >> { %v557_v48 = vpop.permute.xlu1 %556  ;;  %v555_v49 = vpop.permute.xlu0 %554  ;;  %v1259_v23 = vadd.f32 %v1258_v38, %v1257_v28 }
 0x12c   : >> { %v522_v50 = vadd.f32 %v521_v20, %v520_v41  ;;  %v542_v51 = vadd.f32 %v541_v21, %v540_v42  ;;  %v560_v53 = vmul.f32 %v555_v49, %v2241_v9  ;;  %v561_v59 = vmul.f32 %v557_v48, %v2250_v13 }
 0x12d   : >> { %981 = vrot.lane.b32.xlu1 %v2400_v0, %s2008_s18  ;;  %979 = vrot.lane.b32.xlu0 %v2407_v2, %s2008_s18  ;;  %v1260_v44 = vrot.slane %v1259_v23, 1 }
 0x12e   : >> { %1688 = vst [vmem:[%s2317_s20 + $0xb0] sm:$0x1] %v522_v50  ;;  %v543_v31 = vrot.slane %v542_v51, 2  ;;  %v563_v60 = vadd.f32 %v562_v52, %v560_v53 }
 0x12f   : >> { %v600_v56 = vpop.permute.xlu1 %599  ;;  %v598_v57 = vpop.permute.xlu0 %597  ;;  %v1261_v48 = vadd.f32 %v1260_v44, %v1259_v23 }
 0x130   : >> { %v544_v63 = vadd.f32 %v543_v31, %v542_v51  ;;  %v564_v1 = vadd.f32 %v563_v60, %v561_v59  ;;  %v606_v6 = vmul.f32 %v600_v56, %v2243_v10  ;;  %v605_v3 = vmul.f32 %v598_v57, %v2236_v5 }
 0x131   : >> { %985 = vrot.lane.b32.xlu1 %v2419_v29, %s2008_s18  ;;  %983 = vrot.lane.b32.xlu0 %v2410_v4, %s2008_s18  ;;  %1744 = vst [vmem:[%s2317_s20 + $0x2a0] sm:$0x1] %v1261_v48 }
 0x132   : >> { %v545_v61 = vrot.slane %v544_v63, 1  ;;  %v565_v15 = vrot.slane %v564_v1, 4  ;;  %v609_v24 = vadd.f32 %v606_v6, %v605_v3 }
 0x133   : >> { %v604_v17 = vpop.permute.xlu1 %603  ;;  %v602_v18 = vpop.permute.xlu0 %601 }
 0x134   : >> { %v546_v22 = vadd.f32 %v545_v61, %v544_v63  ;;  %v566_v7 = vadd.f32 %v565_v15, %v564_v1  ;;  %v607_v26 = vmul.f32 %v602_v18, %v2241_v9  ;;  %v608_v32 = vmul.f32 %v604_v17, %v2250_v13 }
 0x135   : >> { %1005 = vrot.lane.b32.xlu1 %v2400_v0, %s2009_s6  ;;  %1003 = vrot.lane.b32.xlu0 %v2407_v2, %s2009_s6 }
 0x136   : >> { %1689 = vst [vmem:[%s2317_s20 + $0xc0] sm:$0x1] %v546_v22  ;;  %v567_v30 = vrot.slane %v566_v7, 2  ;;  %v610_v33 = vadd.f32 %v609_v24, %v607_v26 }
 0x137   : >> { %v624_v34 = vpop.permute.xlu1 %623  ;;  %v622_v35 = vpop.permute.xlu0 %621 }
 0x138   : >> { %v568_v14 = vadd.f32 %v567_v30, %v566_v7  ;;  %v611_v39 = vadd.f32 %v610_v33, %v608_v32  ;;  %v630_v11 = vmul.f32 %v624_v34, %v2243_v10  ;;  %v629_v16 = vmul.f32 %v622_v35, %v2236_v5 }
 0x139   : >> { %1009 = vrot.lane.b32.xlu1 %v2419_v29, %s2009_s6  ;;  %1007 = vrot.lane.b32.xlu0 %v2410_v4, %s2009_s6 }
 0x13a   : >> { %v569_v40 = vrot.slane %v568_v14, 1  ;;  %v612_v41 = vrot.slane %v611_v39, 4  ;;  %v633_v20 = vadd.f32 %v630_v11, %v629_v16 }
 0x13b   : >> { %v628_v42 = vpop.permute.xlu1 %627  ;;  %v626_v43 = vpop.permute.xlu0 %625 }
 0x13c   : >> { %v570_v46 = vadd.f32 %v569_v40, %v568_v14  ;;  %v613_v47 = vadd.f32 %v612_v41, %v611_v39  ;;  %v631_v21 = vmul.f32 %v626_v43, %v2241_v9  ;;  %v632_v50 = vmul.f32 %v628_v42, %v2250_v13 }
 0x13d   : >> { %1029 = vrot.lane.b32.xlu1 %v2400_v0, %s2010_s27  ;;  %1027 = vrot.lane.b32.xlu0 %v2407_v2, %s2010_s27 }
 0x13e   : >> { %1690 = vst [vmem:[%s2317_s20 + $0xd0] sm:$0x1] %v570_v46  ;;  %v614_v49 = vrot.slane %v613_v47, 2  ;;  %v634_v51 = vadd.f32 %v633_v20, %v631_v21 }
 0x13f   : >> { %v648_v52 = vpop.permute.xlu1 %647  ;;  %v646_v53 = vpop.permute.xlu0 %645 }
 0x140   : >> { %v615_v54 = vadd.f32 %v614_v49, %v613_v47  ;;  %v635_v31 = vadd.f32 %v634_v51, %v632_v50  ;;  %v654_v59 = vmul.f32 %v648_v52, %v2243_v10  ;;  %v653_v60 = vmul.f32 %v646_v53, %v2236_v5 }
 0x141   : >> { %1033 = vrot.lane.b32.xlu1 %v2419_v29, %s2010_s27  ;;  %1031 = vrot.lane.b32.xlu0 %v2410_v4, %s2010_s27 }
 0x142   : >> { %v616_v27 = vrot.slane %v615_v54, 1  ;;  %v636_v56 = vrot.slane %v635_v31, 4  ;;  %v657_v3 = vadd.f32 %v654_v59, %v653_v60 }
 0x143   : >> { %v652_v57 = vpop.permute.xlu1 %651  ;;  %v650_v63 = vpop.permute.xlu0 %649 }
 0x144   : >> { %v617_v1 = vadd.f32 %v616_v27, %v615_v54  ;;  %v637_v6 = vadd.f32 %v636_v56, %v635_v31  ;;  %v655_v8 = vmul.f32 %v650_v63, %v2241_v9  ;;  %v656_v15 = vmul.f32 %v652_v57, %v2250_v13 }
 0x145   : >> { %1053 = vrot.lane.b32.xlu1 %v2400_v0, %s2011_s28  ;;  %1051 = vrot.lane.b32.xlu0 %v2407_v2, %s2011_s28 }
 0x146   : >> { %1697 = vst [vmem:[%s2317_s20 + $0xf0] sm:$0x1] %v617_v1  ;;  %v638_v61 = vrot.slane %v637_v6, 2  ;;  %v658_v17 = vadd.f32 %v657_v3, %v655_v8 }
 0x147   : >> { %v672_v18 = vpop.permute.xlu1 %671  ;;  %v670_v19 = vpop.permute.xlu0 %669 }
 0x148   : >> { %v639_v22 = vadd.f32 %v638_v61, %v637_v6  ;;  %v659_v7 = vadd.f32 %v658_v17, %v656_v15  ;;  %v678_v24 = vmul.f32 %v672_v18, %v2243_v10  ;;  %v677_v26 = vmul.f32 %v670_v19, %v2236_v5 }
 0x149   : >> { %1057 = vrot.lane.b32.xlu1 %v2419_v29, %s2011_s28  ;;  %1055 = vrot.lane.b32.xlu0 %v2410_v4, %s2011_s28 }
 0x14a   : >> { %v640_v0 = vrot.slane %v639_v22, 1  ;;  %v660_v2 = vrot.slane %v659_v7, 4  ;;  %v681_v34 = vadd.f32 %v678_v24, %v677_v26 }
 0x14b   : >> { %v676_v28 = vpop.permute.xlu1 %675  ;;  %v674_v30 = vpop.permute.xlu0 %673 }
 0x14c   : >> { %v641_v32 = vadd.f32 %v640_v0, %v639_v22  ;;  %v661_v33 = vadd.f32 %v660_v2, %v659_v7  ;;  %v679_v35 = vmul.f32 %v674_v30, %v2241_v9  ;;  %v680_v38 = vmul.f32 %v676_v28, %v2250_v13 }
 0x14d   : >> { %1100 = vrot.lane.b32.xlu1 %v2481_v58, %s2006_s16  ;;  %1098 = vrot.lane.b32.xlu0 %v2484_v62, %s2006_s16 }
 0x14e   : >> { %1698 = vst [vmem:[%s2317_s20 + $0x100] sm:$0x1] %v641_v32  ;;  %v662_v29 = vrot.slane %v661_v33, 2  ;;  %v682_v4 = vadd.f32 %v681_v34, %v679_v35 }
 0x14f   : >> { %v696_v14 = vpop.permute.xlu1 %695  ;;  %v694_v39 = vpop.permute.xlu0 %693 }
 0x150   : >> { %v663_v11 = vadd.f32 %v662_v29, %v661_v33  ;;  %v683_v16 = vadd.f32 %v682_v4, %v680_v38  ;;  %v702_v23 = vmul.f32 %v696_v14, %v2243_v10  ;;  %v701_v40 = vmul.f32 %v694_v39, %v2236_v5 }
 0x151   : >> { %1104 = vrot.lane.b32.xlu1 %v2498_v25, %s2006_s16  ;;  %1102 = vrot.lane.b32.xlu0 %v2491_v12, %s2006_s16 }
 0x152   : >> { %v664_v41 = vrot.slane %v663_v11, 1  ;;  %v684_v42 = vrot.slane %v683_v16, 4  ;;  %v705_v20 = vadd.f32 %v702_v23, %v701_v40 }
 0x153   : >> { %v700_v43 = vpop.permute.xlu1 %699  ;;  %v698_v44 = vpop.permute.xlu0 %697 }
 0x154   : >> { %v665_v46 = vadd.f32 %v664_v41, %v663_v11  ;;  %v685_v47 = vadd.f32 %v684_v42, %v683_v16  ;;  %v703_v21 = vmul.f32 %v698_v44, %v2241_v9  ;;  %v704_v49 = vmul.f32 %v700_v43, %v2250_v13 }
 0x155   : >> { %1124 = vrot.lane.b32.xlu1 %v2481_v58, %s2007_s7  ;;  %1122 = vrot.lane.b32.xlu0 %v2484_v62, %s2007_s7 }
 0x156   : >> { %1699 = vst [vmem:[%s2317_s20 + $0x110] sm:$0x1] %v665_v46  ;;  %v686_v48 = vrot.slane %v685_v47, 2  ;;  %v706_v50 = vadd.f32 %v705_v20, %v703_v21 }
 0x157   : >> { %v720_v51 = vpop.permute.xlu1 %719  ;;  %v718_v52 = vpop.permute.xlu0 %717 }
 0x158   : >> { %v687_v53 = vadd.f32 %v686_v48, %v685_v47  ;;  %v707_v54 = vadd.f32 %v706_v50, %v704_v49  ;;  %v726_v31 = vmul.f32 %v720_v51, %v2243_v10  ;;  %v725_v59 = vmul.f32 %v718_v52, %v2236_v5 }
 0x159   : >> { %1128 = vrot.lane.b32.xlu1 %v2498_v25, %s2007_s7  ;;  %1126 = vrot.lane.b32.xlu0 %v2491_v12, %s2007_s7 }
 0x15a   : >> { %v688_v60 = vrot.slane %v687_v53, 1  ;;  %v708_v27 = vrot.slane %v707_v54, 4  ;;  %v729_v6 = vadd.f32 %v726_v31, %v725_v59 }
 0x15b   : >> { %v724_v56 = vpop.permute.xlu1 %723  ;;  %v722_v57 = vpop.permute.xlu0 %721 }
 0x15c   : >> { %v689_v63 = vadd.f32 %v688_v60, %v687_v53  ;;  %v709_v1 = vadd.f32 %v708_v27, %v707_v54  ;;  %v727_v3 = vmul.f32 %v722_v57, %v2241_v9  ;;  %v728_v8 = vmul.f32 %v724_v56, %v2250_v13 }
 0x15d   : >> { %1148 = vrot.lane.b32.xlu1 %v2481_v58, %s2008_s18  ;;  %1146 = vrot.lane.b32.xlu0 %v2484_v62, %s2008_s18 }
 0x15e   : >> { %1700 = vst [vmem:[%s2317_s20 + $0x120] sm:$0x1] %v689_v63  ;;  %v710_v25 = vrot.slane %v709_v1, 2  ;;  %v730_v61 = vadd.f32 %v729_v6, %v727_v3 }
 0x15f   : >> { %v767_v15 = vpop.permute.xlu1 %766  ;;  %v765_v17 = vpop.permute.xlu0 %764 }
 0x160   : >> { %v711_v18 = vadd.f32 %v710_v25, %v709_v1  ;;  %v731_v19 = vadd.f32 %v730_v61, %v728_v8  ;;  %v773_v22 = vmul.f32 %v767_v15, %v2243_v10  ;;  %v772_v7 = vmul.f32 %v765_v17, %v2236_v5 }
 0x161   : >> { %1172 = vrot.lane.b32.xlu1 %v2481_v58, %s2009_s6  ;;  %1170 = vrot.lane.b32.xlu0 %v2484_v62, %s2009_s6 }
 0x162   : >> { %v712_v24 = vrot.slane %v711_v18, 1  ;;  %v732_v26 = vrot.slane %v731_v19, 4  ;;  %v776_v32 = vadd.f32 %v773_v22, %v772_v7 }
 0x163   : >> { %v771_v0 = vpop.permute.xlu1 %770  ;;  %v769_v2 = vpop.permute.xlu0 %768 }
 0x164   : >> { %v713_v28 = vadd.f32 %v712_v24, %v711_v18  ;;  %v733_v30 = vadd.f32 %v732_v26, %v731_v19  ;;  %v774_v33 = vmul.f32 %v769_v2, %v2241_v9  ;;  %v775_v35 = vmul.f32 %v771_v0, %v2250_v13 }
 0x165   : >> { %1196 = vrot.lane.b32.xlu1 %v2481_v58, %s2010_s27  ;;  %1194 = vrot.lane.b32.xlu0 %v2484_v62, %s2010_s27 }
 0x166   : >> { %1701 = vst [vmem:[%s2317_s20 + $0x130] sm:$0x1] %v713_v28  ;;  %v734_v34 = vrot.slane %v733_v30, 2  ;;  %v777_v29 = vadd.f32 %v776_v32, %v774_v33 }
 0x167   : >> { %v791_v38 = vpop.permute.xlu1 %790  ;;  %v789_v4 = vpop.permute.xlu0 %788 }
 0x168   : >> { %v735_v14 = vadd.f32 %v734_v34, %v733_v30  ;;  %v778_v39 = vadd.f32 %v777_v29, %v775_v35  ;;  %v797_v11 = vmul.f32 %v791_v38, %v2243_v10  ;;  %v796_v16 = vmul.f32 %v789_v4, %v2236_v5 }
 0x169   : >> { %1220 = vrot.lane.b32.xlu1 %v2481_v58, %s2011_s28  ;;  %1218 = vrot.lane.b32.xlu0 %v2484_v62, %s2011_s28 }
 0x16a   : >> { %v736_v23 = vrot.slane %v735_v14, 1  ;;  %v779_v40 = vrot.slane %v778_v39, 4  ;;  %v800_v46 = vadd.f32 %v797_v11, %v796_v16 }
 0x16b   : >> { %v795_v41 = vpop.permute.xlu1 %794  ;;  %v793_v42 = vpop.permute.xlu0 %792 }
 0x16c   : >> { %v737_v43 = vadd.f32 %v736_v23, %v735_v14  ;;  %v780_v44 = vadd.f32 %v779_v40, %v778_v39  ;;  %v798_v47 = vmul.f32 %v793_v42, %v2241_v9  ;;  %v799_v20 = vmul.f32 %v795_v41, %v2250_v13 }
 0x16d   : >> { %1267 = vrot.lane.b32.xlu1 %v2613_v36, %s2006_s16  ;;  %1265 = vrot.lane.b32.xlu0 %v2616_v37, %s2006_s16 }
 0x16e   : >> { %1702 = vst [vmem:[%s2317_s20 + $0x140] sm:$0x1] %v737_v43  ;;  %v781_v58 = vrot.slane %v780_v44, 2  ;;  %v801_v62 = vadd.f32 %v800_v46, %v798_v47 }
 0x16f   : >> { %v815_v21 = vpop.permute.xlu1 %814  ;;  %v813_v48 = vpop.permute.xlu0 %812 }
 0x170   : >> { %v782_v49 = vadd.f32 %v781_v58, %v780_v44  ;;  %v802_v50 = vadd.f32 %v801_v62, %v799_v20  ;;  %v821_v51 = vmul.f32 %v815_v21, %v2243_v10  ;;  %v820_v52 = vmul.f32 %v813_v48, %v2236_v5 }
 0x171   : >> { %1291 = vrot.lane.b32.xlu1 %v2613_v36, %s2007_s7  ;;  %1289 = vrot.lane.b32.xlu0 %v2616_v37, %s2007_s7 }
 0x172   : >> { %v783_v53 = vrot.slane %v782_v49, 1  ;;  %v803_v54 = vrot.slane %v802_v50, 4  ;;  %v824_v56 = vadd.f32 %v821_v51, %v820_v52 }
 0x173   : >> { %v819_v31 = vpop.permute.xlu1 %818  ;;  %v817_v59 = vpop.permute.xlu0 %816 }
 0x174   : >> { %v784_v60 = vadd.f32 %v783_v53, %v782_v49  ;;  %v804_v27 = vadd.f32 %v803_v54, %v802_v50  ;;  %v822_v57 = vmul.f32 %v817_v59, %v2241_v9  ;;  %v823_v1 = vmul.f32 %v819_v31, %v2250_v13 }
 0x175   : >> { %1315 = vrot.lane.b32.xlu1 %v2613_v36, %s2008_s18  ;;  %1313 = vrot.lane.b32.xlu0 %v2616_v37, %s2008_s18 }
 0x176   : >> { %1709 = vst [vmem:[%s2317_s20 + $0x160] sm:$0x1] %v784_v60  ;;  %v805_v63 = vrot.slane %v804_v27, 2  ;;  %v825_v6 = vadd.f32 %v824_v56, %v822_v57 }
 0x177   : >> { %v839_v3 = vpop.permute.xlu1 %838  ;;  %v837_v25 = vpop.permute.xlu0 %836 }
 0x178   : >> { %v806_v8 = vadd.f32 %v805_v63, %v804_v27  ;;  %v826_v61 = vadd.f32 %v825_v6, %v823_v1  ;;  %v845_v15 = vmul.f32 %v839_v3, %v2243_v10  ;;  %v844_v17 = vmul.f32 %v837_v25, %v2236_v5 }
 0x179   : >> { %1339 = vrot.lane.b32.xlu1 %v2613_v36, %s2009_s6  ;;  %1337 = vrot.lane.b32.xlu0 %v2616_v37, %s2009_s6 }
 0x17a   : >> { %v807_v18 = vrot.slane %v806_v8, 1  ;;  %v827_v19 = vrot.slane %v826_v61, 4  ;;  %v848_v0 = vadd.f32 %v845_v15, %v844_v17 }
 0x17b   : >> { %v843_v22 = vpop.permute.xlu1 %842  ;;  %v841_v7 = vpop.permute.xlu0 %840 }
 0x17c   : >> { %v808_v24 = vadd.f32 %v807_v18, %v806_v8  ;;  %v828_v26 = vadd.f32 %v827_v19, %v826_v61  ;;  %v846_v2 = vmul.f32 %v841_v7, %v2241_v9  ;;  %v847_v30 = vmul.f32 %v843_v22, %v2250_v13 }
 0x17d   : >> { %1363 = vrot.lane.b32.xlu1 %v2613_v36, %s2010_s27  ;;  %1361 = vrot.lane.b32.xlu0 %v2616_v37, %s2010_s27 }
 0x17e   : >> { %1710 = vst [vmem:[%s2317_s20 + $0x170] sm:$0x1] %v808_v24  ;;  %v829_v28 = vrot.slane %v828_v26, 2  ;;  %v849_v32 = vadd.f32 %v848_v0, %v846_v2 }
 0x17f   : >> { %v863_v33 = vpop.permute.xlu1 %862  ;;  %v861_v34 = vpop.permute.xlu0 %860 }
 0x180   : >> { %v830_v35 = vadd.f32 %v829_v28, %v828_v26  ;;  %v850_v29 = vadd.f32 %v849_v32, %v847_v30  ;;  %v869_v38 = vmul.f32 %v863_v33, %v2243_v10  ;;  %v868_v4 = vmul.f32 %v861_v34, %v2236_v5  ;;  %v1845_v32 = vld [vmem:[%s2220_s15 + $0xb8] sm:$0xff]  ;;  %s2933_s15 = scalar_lea.hbm (%p229_p0), %s2986_s2, %s1759_s25 }
 0x181   : >> { %1387 = vrot.lane.b32.xlu1 %v2613_v36, %s2011_s28  ;;  %1385 = vrot.lane.b32.xlu0 %v2616_v37, %s2011_s28 }
 0x182   : >> { %v831_v14 = vrot.slane %v830_v35, 1  ;;  %v851_v39 = vrot.slane %v850_v29, 4  ;;  %v872_v41 = vadd.f32 %v869_v38, %v868_v4 }
 0x183   : >> { %v867_v11 = vpop.permute.xlu1 %866  ;;  %v865_v16 = vpop.permute.xlu0 %864 }
 0x184   : >> { %v832_v23 = vadd.f32 %v831_v14, %v830_v35  ;;  %v852_v40 = vadd.f32 %v851_v39, %v850_v29  ;;  %v870_v42 = vmul.f32 %v865_v16, %v2241_v9  ;;  %v871_v43 = vmul.f32 %v867_v11, %v2250_v13 }
 0x185   : >> { %1174 = vrot.lane.b32.xlu1 %v2491_v12, %s2009_s6  ;;  %1150 = vrot.lane.b32.xlu0 %v2491_v12, %s2008_s18 }
 0x186   : >> { %1711 = vst [vmem:[%s2317_s20 + $0x180] sm:$0x1] %v832_v23  ;;  %v853_v36 = vrot.slane %v852_v40, 2  ;;  %v873_v37 = vadd.f32 %v872_v41, %v870_v42 }
 0x187   : >> { %v887_v44 = vpop.permute.xlu1 %886  ;;  %v885_v46 = vpop.permute.xlu0 %884 }
 0x188   : >> { %v854_v47 = vadd.f32 %v853_v36, %v852_v40  ;;  %v874_v58 = vadd.f32 %v873_v37, %v871_v43  ;;  %v893_v20 = vmul.f32 %v887_v44, %v2243_v10  ;;  %v892_v62 = vmul.f32 %v885_v46, %v2236_v5 }
 0x189   : >> { %1222 = vrot.lane.b32.xlu1 %v2491_v12, %s2011_s28  ;;  %1198 = vrot.lane.b32.xlu0 %v2491_v12, %s2010_s27 }
 0x18a   : >> { %v855_v21 = vrot.slane %v854_v47, 1  ;;  %v875_v48 = vrot.slane %v874_v58, 4  ;;  %v896_v53 = vadd.f32 %v893_v20, %v892_v62 }
 0x18b   : >> { %v891_v49 = vpop.permute.xlu1 %890  ;;  %v889_v50 = vpop.permute.xlu0 %888 }
 0x18c   : >> { %v856_v51 = vadd.f32 %v855_v21, %v854_v47  ;;  %v876_v52 = vadd.f32 %v875_v48, %v874_v58  ;;  %v894_v54 = vmul.f32 %v889_v50, %v2241_v9  ;;  %v895_v59 = vmul.f32 %v891_v49, %v2250_v13 }
 0x18d   : >> { %1293 = vrot.lane.b32.xlu1 %v2631_v45, %s2007_s7  ;;  %1269 = vrot.lane.b32.xlu0 %v2631_v45, %s2006_s16 }
 0x18e   : >> { %1712 = vst [vmem:[%s2317_s20 + $0x190] sm:$0x1] %v856_v51  ;;  %v877_v31 = vrot.slane %v876_v52, 2  ;;  %v897_v12 = vadd.f32 %v896_v53, %v894_v54 }
 0x18f   : >> { %v934_v60 = vpop.permute.xlu1 %933  ;;  %v932_v27 = vpop.permute.xlu0 %931 }
 0x190   : >> { %v878_v56 = vadd.f32 %v877_v31, %v876_v52  ;;  %v898_v57 = vadd.f32 %v897_v12, %v895_v59  ;;  %v940_v63 = vmul.f32 %v934_v60, %v2243_v10  ;;  %v939_v1 = vmul.f32 %v932_v27, %v2236_v5 }
 0x191   : >> { %1341 = vrot.lane.b32.xlu1 %v2631_v45, %s2009_s6  ;;  %1317 = vrot.lane.b32.xlu0 %v2631_v45, %s2008_s18 }
 0x192   : >> { %v879_v6 = vrot.slane %v878_v56, 1  ;;  %v899_v3 = vrot.slane %v898_v57, 4  ;;  %v943_v17 = vadd.f32 %v940_v63, %v939_v1 }
 0x193   : >> { %v938_v25 = vpop.permute.xlu1 %937  ;;  %v936_v8 = vpop.permute.xlu0 %935 }
 0x194   : >> { %v880_v61 = vadd.f32 %v879_v6, %v878_v56  ;;  %v900_v15 = vadd.f32 %v899_v3, %v898_v57  ;;  %v941_v18 = vmul.f32 %v936_v8, %v2241_v9  ;;  %v942_v22 = vmul.f32 %v938_v25, %v2250_v13 }
 0x195   : >> { %1389 = vrot.lane.b32.xlu1 %v2631_v45, %s2011_s28  ;;  %1365 = vrot.lane.b32.xlu0 %v2631_v45, %s2010_s27 }
 0x196   : >> { %1713 = vst [vmem:[%s2317_s20 + $0x1a0] sm:$0x1] %v880_v61  ;;  %v901_v19 = vrot.slane %v900_v15, 2  ;;  %v944_v7 = vadd.f32 %v943_v17, %v941_v18 }
 0x197   : >> { %v958_v24 = vpop.permute.xlu1 %957  ;;  %v956_v26 = vpop.permute.xlu0 %955 }
 0x198   : >> { %v902_v0 = vadd.f32 %v901_v19, %v900_v15  ;;  %v945_v2 = vadd.f32 %v944_v7, %v942_v22  ;;  %v964_v28 = vmul.f32 %v958_v24, %v2243_v10  ;;  %v963_v30 = vmul.f32 %v956_v26, %v2236_v5 }
 0x199   : >> { %1176 = vrot.lane.b32.xlu1 %v1845_v32, %s2009_s6  ;;  %1152 = vrot.lane.b32.xlu0 %v1845_v32, %s2008_s18 }
 0x19a   : >> { %v903_v45 = vrot.slane %v902_v0, 1  ;;  %v946_v33 = vrot.slane %v945_v2, 4  ;;  %v967_v4 = vadd.f32 %v964_v28, %v963_v30 }
 0x19b   : >> { %v962_v34 = vpop.permute.xlu1 %961  ;;  %v960_v35 = vpop.permute.xlu0 %959 }
 0x19c   : >> { %v904_v29 = vadd.f32 %v903_v45, %v902_v0  ;;  %v947_v38 = vadd.f32 %v946_v33, %v945_v2  ;;  %v965_v14 = vmul.f32 %v960_v35, %v2241_v9  ;;  %v966_v11 = vmul.f32 %v962_v34, %v2250_v13 }
 0x19d   : >> { %1224 = vrot.lane.b32.xlu1 %v1845_v32, %s2011_s28  ;;  %1200 = vrot.lane.b32.xlu0 %v1845_v32, %s2010_s27 }
 0x19e   : >> { %1714 = vst [vmem:[%s2317_s20 + $0x1b0] sm:$0x1] %v904_v29  ;;  %v948_v39 = vrot.slane %v947_v38, 2  ;;  %v968_v16 = vadd.f32 %v967_v4, %v965_v14 }
 0x19f   : >> { %v982_v23 = vpop.permute.xlu1 %981  ;;  %v980_v40 = vpop.permute.xlu0 %979 }
 0x1a0   : >> { %v949_v41 = vadd.f32 %v948_v39, %v947_v38  ;;  %v969_v42 = vadd.f32 %v968_v16, %v966_v11  ;;  %v988_v36 = vmul.f32 %v982_v23, %v2243_v10  ;;  %v987_v43 = vmul.f32 %v980_v40, %v2236_v5 }
 0x1a1   : >> { %1295 = vrot.lane.b32.xlu1 %v2645_v55, %s2007_s7  ;;  %1271 = vrot.lane.b32.xlu0 %v2645_v55, %s2006_s16  ;;  %s1906_s16 = scalar_lea.vmem (%p229_p0), %s2935_s29, 12544 }
 0x1a2   : >> { %v950_v37 = vrot.slane %v949_v41, 1  ;;  %v970_v44 = vrot.slane %v969_v42, 4  ;;  %v991_v62 = vadd.f32 %v988_v36, %v987_v43  ;;  %p1907_p3 = scmp.ne.s32.totalorder (%p229_p0), %s2935_s29, %s1906_s16  ;;  %p1914_p9 = scmp.lt.s32.totalorder (%p229_p0), %s1912_s12, %s1906_s16 }
 0x1a3   : >> { %v986_v46 = vpop.permute.xlu1 %985  ;;  %v984_v47 = vpop.permute.xlu0 %983 }
 0x1a4   : >> { %v951_v58 = vadd.f32 %v950_v37, %v949_v41  ;;  %v971_v20 = vadd.f32 %v970_v44, %v969_v42  ;;  %v989_v21 = vmul.f32 %v984_v47, %v2241_v9  ;;  %v990_v49 = vmul.f32 %v986_v46, %v2250_v13  ;;  %p1908_p13 = pnand (%p229_p0), %p1907_p3, %p2997_p12  ;;  %p1915_p11 = por (%p229_p0), %p1914_p9, %p1913_p10 }
 0x1a5   : >> { %1343 = vrot.lane.b32.xlu1 %v2645_v55, %s2009_s6  ;;  %1319 = vrot.lane.b32.xlu0 %v2645_v55, %s2008_s18 }
 0x1a6   : >> { %1721 = vst [vmem:[%s2317_s20 + $0x1d0] sm:$0x1] %v951_v58  ;;  %v972_v48 = vrot.slane %v971_v20, 2  ;;  %v992_v50 = vadd.f32 %v991_v62, %v989_v21  ;;  %p1909_p7 = pneg (%p229_p0), %p1908_p13 }
 0x1a7   : >> { %v1006_v51 = vpop.permute.xlu1 %1005  ;;  %v1004_v52 = vpop.permute.xlu0 %1003 }
 0x1a8   : >> { %v973_v53 = vadd.f32 %v972_v48, %v971_v20  ;;  %v993_v54 = vadd.f32 %v992_v50, %v990_v49  ;;  %v1012_v31 = vmul.f32 %v1006_v51, %v2243_v10  ;;  %v1011_v59 = vmul.f32 %v1004_v52, %v2236_v5  ;;  %p1916_p1 = pnand (%p229_p0), %p1915_p11, %p1909_p7 }
 0x1a9   : >> { %1391 = vrot.lane.b32.xlu1 %v2645_v55, %s2011_s28  ;;  %1367 = vrot.lane.b32.xlu0 %v2645_v55, %s2010_s27 }
 0x1aa   : >> { %v974_v12 = vrot.slane %v973_v53, 1  ;;  %v994_v60 = vrot.slane %v993_v54, 4  ;;  %v1015_v1 = vadd.f32 %v1012_v31, %v1011_v59 }
 0x1ab   : >> { %v1010_v27 = vpop.permute.xlu1 %1009  ;;  %v1008_v56 = vpop.permute.xlu0 %1007 }
 0x1ac   : >> { %v975_v57 = vadd.f32 %v974_v12, %v973_v53  ;;  %v995_v63 = vadd.f32 %v994_v60, %v993_v54  ;;  %v1013_v6 = vmul.f32 %v1008_v56, %v2241_v9  ;;  %v1014_v25 = vmul.f32 %v1010_v27, %v2250_v13 }
 0x1ae   : >> { %1722 = vst [vmem:[%s2317_s20 + $0x1e0] sm:$0x1] %v975_v57  ;;  %v996_v3 = vrot.slane %v995_v63, 2  ;;  %v1016_v8 = vadd.f32 %v1015_v1, %v1013_v6 }
 0x1af   : >> { %v1030_v61 = vpop.permute.xlu1 %1029  ;;  %v1028_v15 = vpop.permute.xlu0 %1027 }
 0x1b0   : >> { %v997_v17 = vadd.f32 %v996_v3, %v995_v63  ;;  %v1017_v18 = vadd.f32 %v1016_v8, %v1014_v25  ;;  %v1036_v55 = vmul.f32 %v1030_v61, %v2243_v10  ;;  %v1035_v19 = vmul.f32 %v1028_v15, %v2236_v5 }
 0x1b2   : >> { %v998_v22 = vrot.slane %v997_v17, 1  ;;  %v1018_v7 = vrot.slane %v1017_v18, 4  ;;  %v1039_v28 = vadd.f32 %v1036_v55, %v1035_v19 }
 0x1b3   : >> { %v1034_v24 = vpop.permute.xlu1 %1033  ;;  %v1032_v26 = vpop.permute.xlu0 %1031 }
 0x1b4   : >> { %v999_v0 = vadd.f32 %v998_v22, %v997_v17  ;;  %v1019_v2 = vadd.f32 %v1018_v7, %v1017_v18  ;;  %v1037_v30 = vmul.f32 %v1032_v26, %v2241_v9  ;;  %v1038_v45 = vmul.f32 %v1034_v24, %v2250_v13 }
 0x1b6   : >> { %1723 = vst [vmem:[%s2317_s20 + $0x1f0] sm:$0x1] %v999_v0  ;;  %v1020_v32 = vrot.slane %v1019_v2, 2  ;;  %v1040_v33 = vadd.f32 %v1039_v28, %v1037_v30 }
 0x1b7   : >> { %v1054_v34 = vpop.permute.xlu1 %1053  ;;  %v1052_v35 = vpop.permute.xlu0 %1051 }
 0x1b8   : >> { %v1021_v29 = vadd.f32 %v1020_v32, %v1019_v2  ;;  %v1041_v38 = vadd.f32 %v1040_v33, %v1038_v45  ;;  %v1060_v4 = vmul.f32 %v1054_v34, %v2243_v10  ;;  %v1059_v14 = vmul.f32 %v1052_v35, %v2236_v5 }
 0x1ba   : >> { %v1022_v39 = vrot.slane %v1021_v29, 1  ;;  %v1042_v11 = vrot.slane %v1041_v38, 4  ;;  %v1063_v42 = vadd.f32 %v1060_v4, %v1059_v14 }
 0x1bb   : >> { %v1058_v16 = vpop.permute.xlu1 %1057  ;;  %v1056_v23 = vpop.permute.xlu0 %1055 }
 0x1bc   : >> { %v1023_v40 = vadd.f32 %v1022_v39, %v1021_v29  ;;  %v1043_v41 = vadd.f32 %v1042_v11, %v1041_v38  ;;  %v1061_v36 = vmul.f32 %v1056_v23, %v2241_v9  ;;  %v1062_v37 = vmul.f32 %v1058_v16, %v2250_v13 }
 0x1be   : >> { %1724 = vst [vmem:[%s2317_s20 + $0x200] sm:$0x1] %v1023_v40  ;;  %v1044_v43 = vrot.slane %v1043_v41, 2  ;;  %v1064_v44 = vadd.f32 %v1063_v42, %v1061_v36 }
 0x1bf   : >> { %v1101_v46 = vpop.permute.xlu1 %1100  ;;  %v1099_v47 = vpop.permute.xlu0 %1098 }
 0x1c0   : >> { %v1045_v58 = vadd.f32 %v1044_v43, %v1043_v41  ;;  %v1065_v20 = vadd.f32 %v1064_v44, %v1062_v37  ;;  %v1107_v62 = vmul.f32 %v1101_v46, %v2243_v10  ;;  %v1106_v21 = vmul.f32 %v1099_v47, %v2236_v5 }
 0x1c2   : >> { %v1046_v48 = vrot.slane %v1045_v58, 1  ;;  %v1066_v49 = vrot.slane %v1065_v20, 4  ;;  %v1110_v54 = vadd.f32 %v1107_v62, %v1106_v21 }
 0x1c3   : >> { %v1105_v50 = vpop.permute.xlu1 %1104  ;;  %v1103_v51 = vpop.permute.xlu0 %1102 }
 0x1c4   : >> { %v1047_v52 = vadd.f32 %v1046_v48, %v1045_v58  ;;  %v1067_v53 = vadd.f32 %v1066_v49, %v1065_v20  ;;  %v1108_v31 = vmul.f32 %v1103_v51, %v2241_v9  ;;  %v1109_v12 = vmul.f32 %v1105_v50, %v2250_v13 }
 0x1c6   : >> { %1725 = vst [vmem:[%s2317_s20 + $0x210] sm:$0x1] %v1047_v52  ;;  %v1068_v59 = vrot.slane %v1067_v53, 2  ;;  %v1111_v60 = vadd.f32 %v1110_v54, %v1108_v31 }
 0x1c7   : >> { %v1125_v27 = vpop.permute.xlu1 %1124  ;;  %v1123_v56 = vpop.permute.xlu0 %1122 }
 0x1c8   : >> { %v1069_v57 = vadd.f32 %v1068_v59, %v1067_v53  ;;  %v1112_v63 = vadd.f32 %v1111_v60, %v1109_v12  ;;  %v1131_v1 = vmul.f32 %v1125_v27, %v2243_v10  ;;  %v1130_v6 = vmul.f32 %v1123_v56, %v2236_v5 }
 0x1ca   : >> { %v1070_v3 = vrot.slane %v1069_v57, 1  ;;  %v1113_v25 = vrot.slane %v1112_v63, 4  ;;  %v1134_v18 = vadd.f32 %v1131_v1, %v1130_v6 }
 0x1cb   : >> { %v1129_v8 = vpop.permute.xlu1 %1128  ;;  %v1127_v61 = vpop.permute.xlu0 %1126 }
 0x1cc   : >> { %v1071_v15 = vadd.f32 %v1070_v3, %v1069_v57  ;;  %v1114_v17 = vadd.f32 %v1113_v25, %v1112_v63  ;;  %v1132_v55 = vmul.f32 %v1127_v61, %v2241_v9  ;;  %v1133_v22 = vmul.f32 %v1129_v8, %v2250_v13 }
 0x1ce   : >> { %1726 = vst [vmem:[%s2317_s20 + $0x220] sm:$0x1] %v1071_v15  ;;  %v1115_v19 = vrot.slane %v1114_v17, 2  ;;  %v1135_v7 = vadd.f32 %v1134_v18, %v1132_v55 }
 0x1cf   : >> { %v1149_v24 = vpop.permute.xlu1 %1148  ;;  %v1147_v26 = vpop.permute.xlu0 %1146 }
 0x1d0   : >> { %v1116_v0 = vadd.f32 %v1115_v19, %v1114_v17  ;;  %v1136_v2 = vadd.f32 %v1135_v7, %v1133_v22  ;;  %v1155_v54 = vmul.f32 %v1149_v24, %v2243_v10  ;;  %v1154_v31 = vmul.f32 %v1147_v26, %v2236_v5 }
 0x1d2   : >> { %v1117_v28 = vrot.slane %v1116_v0, 1  ;;  %v1137_v30 = vrot.slane %v1136_v2, 4  ;;  %v1158_v17 = vadd.f32 %v1155_v54, %v1154_v31 }
 0x1d3   : >> { %v1173_v32 = vpop.permute.xlu1 %1172  ;;  %v1171_v45 = vpop.permute.xlu0 %1170 }
 0x1d4   : >> { %v1118_v33 = vadd.f32 %v1117_v28, %v1116_v0  ;;  %v1138_v34 = vadd.f32 %v1137_v30, %v1136_v2  ;;  %v1179_v59 = vmul.f32 %v1173_v32, %v2243_v10  ;;  %v1178_v12 = vmul.f32 %v1171_v45, %v2236_v5 }
 0x1d6   : >> { %1733 = vst [vmem:[%s2317_s20 + $0x240] sm:$0x1] %v1118_v33  ;;  %v1139_v35 = vrot.slane %v1138_v34, 2  ;;  %v1182_v18 = vadd.f32 %v1179_v59, %v1178_v12 }
 0x1d7   : >> { %v1197_v29 = vpop.permute.xlu1 %1196  ;;  %v1195_v38 = vpop.permute.xlu0 %1194 }
 0x1d8   : >> { %v1140_v4 = vadd.f32 %v1139_v35, %v1138_v34  ;;  %v1203_v60 = vmul.f32 %v1197_v29, %v2243_v10  ;;  %v1202_v27 = vmul.f32 %v1195_v38, %v2236_v5 }
 0x1da   : >> { %v1141_v14 = vrot.slane %v1140_v4, 1  ;;  %v1206_v55 = vadd.f32 %v1203_v60, %v1202_v27 }
 0x1db   : >> { %v1221_v39 = vpop.permute.xlu1 %1220  ;;  %v1219_v11 = vpop.permute.xlu0 %1218 }
 0x1dc   : >> { %v1142_v16 = vadd.f32 %v1141_v14, %v1140_v4  ;;  %v1227_v56 = vmul.f32 %v1221_v39, %v2243_v10  ;;  %v1226_v57 = vmul.f32 %v1219_v11, %v2236_v5 }
 0x1de   : >> { %1734 = vst [vmem:[%s2317_s20 + $0x250] sm:$0x1] %v1142_v16  ;;  %v1230_v19 = vadd.f32 %v1227_v56, %v1226_v57 }
 0x1df   : >> { %v1268_v23 = vpop.permute.xlu1 %1267  ;;  %v1266_v40 = vpop.permute.xlu0 %1265 }
 0x1e0   : >> { %v1274_v63 = vmul.f32 %v1268_v23, %v2243_v10  ;;  %v1273_v1 = vmul.f32 %v1266_v40, %v2236_v5 }
 0x1e2   : >> { %v1277_v0 = vadd.f32 %v1274_v63, %v1273_v1 }
 0x1e3   : >> { %v1292_v41 = vpop.permute.xlu1 %1291  ;;  %v1290_v42 = vpop.permute.xlu0 %1289 }
 0x1e4   : >> { %v1298_v6 = vmul.f32 %v1292_v41, %v2243_v10  ;;  %v1297_v3 = vmul.f32 %v1290_v42, %v2236_v5 }
 0x1e6   : >> { %v1301_v2 = vadd.f32 %v1298_v6, %v1297_v3 }
 0x1e7   : >> { %v1316_v36 = vpop.permute.xlu1 %1315  ;;  %v1314_v43 = vpop.permute.xlu0 %1313 }
 0x1e8   : >> { %v1322_v22 = vmul.f32 %v1316_v36, %v2243_v10  ;;  %v1321_v7 = vmul.f32 %v1314_v43, %v2236_v5 }
 0x1ea   : >> { %v1325_v11 = vadd.f32 %v1322_v22, %v1321_v7 }
 0x1eb   : >> { %v1340_v37 = vpop.permute.xlu1 %1339  ;;  %v1338_v44 = vpop.permute.xlu0 %1337 }
 0x1ec   : >> { %v1346_v24 = vmul.f32 %v1340_v37, %v2243_v10  ;;  %v1345_v26 = vmul.f32 %v1338_v44, %v2236_v5 }
 0x1ee   : >> { %v1349_v16 = vadd.f32 %v1346_v24, %v1345_v26 }
 0x1ef   : >> { %v1364_v46 = vpop.permute.xlu1 %1363  ;;  %v1362_v47 = vpop.permute.xlu0 %1361 }
 0x1f0   : >> { %v1370_v38 = vmul.f32 %v1364_v46, %v2243_v10  ;;  %v1369_v4 = vmul.f32 %v1362_v47, %v2236_v5 }
 0x1f3   : >> { %v1388_v58 = vpop.permute.xlu1 %1387  ;;  %v1386_v20 = vpop.permute.xlu0 %1385 }
 0x1f4   : >> { %v1394_v14 = vmul.f32 %v1388_v58, %v2243_v10  ;;  %v1393_v39 = vmul.f32 %v1386_v20, %v2236_v5  ;;  %v1373_v58 = vadd.f32 %v1370_v38, %v1369_v4 }
 0x1f6   : >> { %v1397_v5 = vadd.f32 %v1394_v14, %v1393_v39 }
 0x1f7   : >> { %v1175_v62 = vpop.permute.xlu1 %1174  ;;  %v1151_v21 = vpop.permute.xlu0 %1150 }
 0x1f8   : >> { %v1180_v61 = vmul.f32 %v1175_v62, %v2241_v9  ;;  %v1156_v15 = vmul.f32 %v1151_v21, %v2241_v9 }
 0x1fa   : >> { %v1183_v33 = vadd.f32 %v1182_v18, %v1180_v61  ;;  %v1159_v34 = vadd.f32 %v1158_v17, %v1156_v15 }
 0x1fb   : >> { %v1223_v48 = vpop.permute.xlu1 %1222  ;;  %v1199_v49 = vpop.permute.xlu0 %1198 }
 0x1fc   : >> { %v1228_v28 = vmul.f32 %v1223_v48, %v2241_v9  ;;  %v1204_v30 = vmul.f32 %v1199_v49, %v2241_v9 }
 0x1fe   : >> { %v1231_v41 = vadd.f32 %v1230_v19, %v1228_v28  ;;  %v1207_v42 = vadd.f32 %v1206_v55, %v1204_v30 }
 0x1ff   : >> { %v1294_v50 = vpop.permute.xlu1 %1293  ;;  %v1270_v51 = vpop.permute.xlu0 %1269 }
 0x200   : >> { %v1299_v36 = vmul.f32 %v1294_v50, %v2241_v9  ;;  %v1275_v43 = vmul.f32 %v1270_v51, %v2241_v9 }
 0x202   : >> { %v1302_v31 = vadd.f32 %v1301_v2, %v1299_v36  ;;  %v1278_v51 = vadd.f32 %v1277_v0, %v1275_v43 }
 0x203   : >> { %v1342_v52 = vpop.permute.xlu1 %1341  ;;  %v1318_v53 = vpop.permute.xlu0 %1317 }
 0x204   : >> { %v1347_v20 = vmul.f32 %v1342_v52, %v2241_v9  ;;  %v1323_v21 = vmul.f32 %v1318_v53, %v2241_v9 }
 0x206   : >> { %v1350_v6 = vadd.f32 %v1349_v16, %v1347_v20  ;;  %v1326_v52 = vadd.f32 %v1325_v11, %v1323_v21 }
 0x207   : >> { %v1390_v25 = vpop.permute.xlu1 %1389  ;;  %v1366_v8 = vpop.permute.xlu0 %1365 }
 0x208   : >> { %v1395_v59 = vmul.f32 %v1390_v25, %v2241_v9  ;;  %v1371_v12 = vmul.f32 %v1366_v8, %v2241_v9 }
 0x20a   : >> { %v1398_v55 = vadd.f32 %v1397_v5, %v1395_v59  ;;  %v1374_v25 = vadd.f32 %v1373_v58, %v1371_v12 }
 0x20b   : >> { %v1177_v32 = vpop.permute.xlu1 %1176  ;;  %v1153_v45 = vpop.permute.xlu0 %1152 }
 0x20c   : >> { %v1181_v35 = vmul.f32 %v1177_v32, %v2250_v13  ;;  %v1157_v29 = vmul.f32 %v1153_v45, %v2250_v13 }
 0x20e   : >> { %v1184_v23 = vadd.f32 %v1183_v33, %v1181_v35  ;;  %v1160_v40 = vadd.f32 %v1159_v34, %v1157_v29 }
 0x20f   : >> { %v1225_v37 = vpop.permute.xlu1 %1224  ;;  %v1201_v44 = vpop.permute.xlu0 %1200 }
 0x210   : >> { %v1185_v62 = vrot.slane %v1184_v23, 4  ;;  %v1161_v46 = vrot.slane %v1160_v40, 4  ;;  %v1229_v47 = vmul.f32 %v1225_v37, %v2250_v13  ;;  %v1205_v10 = vmul.f32 %v1201_v44, %v2250_v13 }
 0x212   : >> { %v1186_v48 = vadd.f32 %v1185_v62, %v1184_v23  ;;  %v1162_v49 = vadd.f32 %v1161_v46, %v1160_v40  ;;  %v1232_v54 = vadd.f32 %v1231_v41, %v1229_v47  ;;  %v1208_v50 = vadd.f32 %v1207_v42, %v1205_v10 }
 0x213   : >> { %v1296_v60 = vpop.permute.xlu1 %1295  ;;  %v1272_v27 = vpop.permute.xlu0 %1271 }
 0x214   : >> { %v1187_v56 = vrot.slane %v1186_v48, 2  ;;  %v1163_v57 = vrot.slane %v1162_v49, 2  ;;  %v1233_v63 = vrot.slane %v1232_v54, 4  ;;  %v1209_v1 = vrot.slane %v1208_v50, 4 }
 0x215   : >> { %v1300_v53 = vmul.f32 %v1296_v60, %v2250_v13  ;;  %v1276_v3 = vmul.f32 %v1272_v27, %v2250_v13 }
 0x216   : >> { %v1188_v61 = vadd.f32 %v1187_v56, %v1186_v48  ;;  %v1164_v15 = vadd.f32 %v1163_v57, %v1162_v49  ;;  %v1234_v17 = vadd.f32 %v1233_v63, %v1232_v54  ;;  %v1210_v18 = vadd.f32 %v1209_v1, %v1208_v50 }
 0x217   : >> { %v1303_v19 = vadd.f32 %v1302_v31, %v1300_v53  ;;  %v1279_v9 = vadd.f32 %v1278_v51, %v1276_v3  ;;  %v1344_v8 = vpop.permute.xlu1 %1343  ;;  %v1320_v22 = vpop.permute.xlu0 %1319 }
 0x218   : >> { %v1189_v7 = vrot.slane %v1188_v61, 1  ;;  %v1165_v24 = vrot.slane %v1164_v15, 1  ;;  %v1235_v26 = vrot.slane %v1234_v17, 2  ;;  %v1211_v0 = vrot.slane %v1210_v18, 2 }
 0x219   : >> { %v1304_v2 = vrot.slane %v1303_v19, 4  ;;  %v1280_v28 = vrot.slane %v1279_v9, 4  ;;  %v1348_v30 = vmul.f32 %v1344_v8, %v2250_v13  ;;  %v1324_v32 = vmul.f32 %v1320_v22, %v2250_v13 }
 0x21a   : >> { %v1190_v45 = vadd.f32 %v1189_v7, %v1188_v61  ;;  %v1166_v33 = vadd.f32 %v1165_v24, %v1164_v15  ;;  %v1236_v34 = vadd.f32 %v1235_v26, %v1234_v17  ;;  %v1212_v35 = vadd.f32 %v1211_v0, %v1210_v18 }
 0x21b   : >> { %v1305_v29 = vadd.f32 %v1304_v2, %v1303_v19  ;;  %v1281_v38 = vadd.f32 %v1280_v28, %v1279_v9  ;;  %v1351_v4 = vadd.f32 %v1350_v6, %v1348_v30  ;;  %v1327_v14 = vadd.f32 %v1326_v52, %v1324_v32  ;;  %v1392_v39 = vpop.permute.xlu1 %1391  ;;  %v1368_v11 = vpop.permute.xlu0 %1367 }
 0x21c   : >> { %1736 = vst [vmem:[%s2317_s20 + $0x270] sm:$0x1] %v1190_v45  ;;  %1735 = vst [vmem:[%s2317_s20 + $0x260] sm:$0x1] %v1166_v33  ;;  %v1237_v16 = vrot.slane %v1236_v34, 1  ;;  %v1213_v23 = vrot.slane %v1212_v35, 1  ;;  %v1396_v40 = vmul.f32 %v1392_v39, %v2250_v13  ;;  %v1372_v41 = vmul.f32 %v1368_v11, %v2250_v13 }
 0x21d   : >> { %v1306_v42 = vrot.slane %v1305_v29, 2  ;;  %v1282_v36 = vrot.slane %v1281_v38, 2  ;;  %v1352_v43 = vrot.slane %v1351_v4, 4  ;;  %v1328_v37 = vrot.slane %v1327_v14, 4 }
 0x21e   : >> { %v1238_v44 = vadd.f32 %v1237_v16, %v1236_v34  ;;  %v1214_v62 = vadd.f32 %v1213_v23, %v1212_v35  ;;  %v1399_v46 = vadd.f32 %v1398_v55, %v1396_v40  ;;  %v1375_v47 = vadd.f32 %v1374_v25, %v1372_v41 }
 0x21f   : >> { %v1307_v10 = vadd.f32 %v1306_v42, %v1305_v29  ;;  %v1283_v58 = vadd.f32 %v1282_v36, %v1281_v38  ;;  %v1353_v5 = vadd.f32 %v1352_v43, %v1351_v4  ;;  %v1329_v20 = vadd.f32 %v1328_v37, %v1327_v14 }
 0x220   : >> { %1738 = vst [vmem:[%s2317_s20 + $0x290] sm:$0x1] %v1238_v44  ;;  %1737 = vst [vmem:[%s2317_s20 + $0x280] sm:$0x1] %v1214_v62  ;;  %v1400_v21 = vrot.slane %v1399_v46, 4  ;;  %v1376_v48 = vrot.slane %v1375_v47, 4 }
 0x221   : >> { %v1308_v49 = vrot.slane %v1307_v10, 1  ;;  %v1284_v13 = vrot.slane %v1283_v58, 1  ;;  %v1354_v54 = vrot.slane %v1353_v5, 2  ;;  %v1330_v50 = vrot.slane %v1329_v20, 2 }
 0x222   : >> { %v1401_v31 = vadd.f32 %v1400_v21, %v1399_v46  ;;  %v1377_v51 = vadd.f32 %v1376_v48, %v1375_v47 }
 0x223   : >> { %v1309_v59 = vadd.f32 %v1308_v49, %v1307_v10  ;;  %v1285_v12 = vadd.f32 %v1284_v13, %v1283_v58  ;;  %v1355_v60 = vadd.f32 %v1354_v54, %v1353_v5  ;;  %v1331_v27 = vadd.f32 %v1330_v50, %v1329_v20 }
 0x224   : >> { %v1402_v56 = vrot.slane %v1401_v31, 2  ;;  %v1378_v57 = vrot.slane %v1377_v51, 2 }
 0x225   : >> { %1746 = vst [vmem:[%s2317_s20 + $0x2c0] sm:$0x1] %v1309_v59  ;;  %1745 = vst [vmem:[%s2317_s20 + $0x2b0] sm:$0x1] %v1285_v12  ;;  %v1356_v63 = vrot.slane %v1355_v60, 1  ;;  %v1332_v1 = vrot.slane %v1331_v27, 1 }
 0x226   : >> { %v1403_v6 = vadd.f32 %v1402_v56, %v1401_v31  ;;  %v1379_v52 = vadd.f32 %v1378_v57, %v1377_v51  ;;  %231 = sbr.rel (!%p229_p0) target bundleno = 90 (0x5a), region = 150 }
 0x227   : >> { %v1357_v53 = vadd.f32 %v1356_v63, %v1355_v60  ;;  %v1333_v3 = vadd.f32 %v1332_v1, %v1331_v27 }
 0x228   : >> { %v1404_v61 = vrot.slane %v1403_v6, 1  ;;  %v1380_v15 = vrot.slane %v1379_v52, 1 }
 0x229   : >> { %1748 = vst [vmem:[%s2317_s20 + $0x2e0] sm:$0x1] %v1357_v53  ;;  %1747 = vst [vmem:[%s2317_s20 + $0x2d0] sm:$0x1] %v1333_v3 }
 0x22a   : >> { %v1405_v17 = vadd.f32 %v1404_v61, %v1403_v6  ;;  %v1381_v18 = vadd.f32 %v1380_v15, %v1379_v52 }
 0x22c   : >> { %1750 = vst [vmem:[%s2317_s20 + $0x300] sm:$0x1] %v1405_v17  ;;  %1749 = vst [vmem:[%s2317_s20 + $0x2f0] sm:$0x1] %v1381_v18 }
 0x22d   : > { %1919 = shalt.err (!%p1916_p1)
}
 0x22e   : > { %s1920_s19 = scalar_lea.hbm %s2933_s15, 12544  ;;  %s1924_s18 = scalar_lea.hbm %s2986_s2, 25088 }
 0x22f   : > { %p1921_p6 = scmp.ne.s32.totalorder %s2933_s15, %s1920_s19  ;;  %p1925_p4 = scmp.lt.u32.totalorder %s2933_s15, %s2986_s2 }
 0x230   : > { %p1926_p8 = scmp.lt.u32.totalorder %s1924_s18, %s1920_s19  ;;  %p1928_p3 = scmp.lt.u32.totalorder %s1920_s19, %s2933_s15 }
 0x231   : > { %p1922_p2 = pnand %p1921_p6, %p2997_p12 }
 0x232   : > { %p1927_p0 = por %p1926_p8, %p1925_p4 }
 0x233   : > { %p1923_p5 = pneg %p1922_p2 }
 0x234   : > { %p1929_p13 = por %p1928_p3, %p1927_p0 }
 0x236   : > { %p1930_p7 = pnand %p1929_p13, %p1923_p5 }
 0x238   : > { %1933 = shalt.err (!%p1930_p7)
}
 0x239   : > { %s2013_s27 = smov 128   ;;  %s2014_s28 = smov 8  }
 0x23a   : > { %1764 = dma.vmem_to_hbm [thread:$0]  (%p2997_p12), %s2935_s29, 12544, %s2933_s15, %s1410_s21, %s2013_s27, %s2013_s27, %s2014_s28  }
 0x23b PF: > { %s1440_s25 = sand.u32 1, %s1976_s9   ;;  %p2998_p10 = scmp.ne.s32.totalorder %s2992_s24, 0 }
 0x23c   : > { %p2999_p9 = scmp.ge.s32.totalorder %s1996_s14, 2  ;;  %s1441_s8 = scalar_lea.sflag [#allocation4], %s1440_s25 }
 0x23e   : > { %p1774_p11 = pnand %p2999_p9, %p2998_p10 }
 0x240   : > { %1971 = dma.done.wait (!%p1774_p11), %s1441_s8, 12544  }
 0x241   : > { %1973 = vsyncadd (!%p1774_p11), %s1441_s8, 4294954752  ;;  %s21_s14 = sadd.s32 1, %s1996_s14   ;;  %s3000_s9 = smov %s1980_s10 }
 0x242   : > { %p18_p1 = scmp.ge.s32.totalorder %s21_s14, 4   ;;  %s3001_s10 = smov %s1984_s11 }
 0x243   : > { %s3002_s11 = smov %s2086_s23  ;;  %s3003_s12 = smov %s1992_s13 }
 0x244   : > { %s3004_s13 = smov %s3006_s17  ;;  %20 = sbr.rel (!%p18_p1) target bundleno = 8 (0x8), region = 161 }
 0x24b   :  { %1446 = vsyncpa [#allocation3], 1 }
 0x24c   :  { %1448 = vsyncpa [#allocation3 + $0x1], 1 }
 0x24d   :  { %1449 = vsyncpa [#allocation6], 1 }
 0x24e   :  { %1451 = vsyncpa [#allocation6 + $0x1], 1 }
 0x24f   :  { %1452 = vsyncpa [#allocation4], 1 }
 0x250   :  { %1454 = vsyncpa [#allocation4 + $0x1], 1 }

</bundles_post_ra>
